<compile_context>
chip_gen: v7x
topology: tpu7x:2x2x1
jax: 0.10.0
libtpu: 0.0.40
codegen_flags: <defaults>
</compile_context>

<pallas_src>
import functools

import jax
import jax.numpy as jnp
from jax.experimental import pallas as pl
from jax.experimental.pallas import tpu as pltpu


def _sublane_multiple(dtype) -> int:
    itemsize = jnp.dtype(dtype).itemsize
    return {4: 8, 2: 16, 1: 32}.get(itemsize, 8)


def _round_up(x: int, m: int) -> int:
    return ((x + m - 1) // m) * m


def _gather_concat_kernel(P, TQ, ids_ref, soft_ref, embed_hbm, out_ref, sem):
    """Fill one (TQ, D) tile of the combined [soft_prompt ; token_embeds] output.

    Global output row t = tile*TQ + r:
      t <  P : soft_prompt row t (vectorized fixup from the VMEM-resident table)
      t >= P : embedding row ids[b, t] (manual HBM->VMEM row DMA, straight into
               the output tile)
    Rows past the real sequence end (partial last tile) are written but are
    dropped by Pallas on writeback (output is exactly (B, T, D)).
    """
    b = pl.program_id(0)
    t0 = pl.program_id(1) * TQ

    # ---- Gather phase: only if this tile contains any non-soft row. --------
    @pl.when(t0 + TQ > P)
    def _():
        # Branch-free, fully unrolled issue of TQ row-gather DMAs, all
        # signalling ONE semaphore and landing directly in the output tile.
        # Soft rows / pad rows have ids == 0, so they fetch embedding row 0
        # and are overwritten (soft) or discarded (pad) -- at most P + (TQ-1)
        # wasted rows per batch element, negligible vs. total traffic.
        for r in range(TQ):
            idx = ids_ref[b, t0 + r]
            pltpu.make_async_copy(
                embed_hbm.at[pl.ds(idx, 1), :],
                out_ref.at[pl.ds(r, 1), :],
                sem.at[0],
            ).start()

        # Single aggregate wait for the whole tile: only the destination
        # shape (-> byte count) and the semaphore matter for .wait(); the TQ
        # row copies above each delivered D*itemsize bytes on this semaphore.
        pltpu.make_async_copy(out_ref, out_ref, sem.at[0]).wait()

    # ---- Soft-prompt fixup: at most cdiv(P, TQ) tiles per batch element. ---
    @pl.when(t0 < P)
    def _():
        t0m = pl.multiple_of(t0, TQ)
        soft_rows = soft_ref[pl.ds(t0m, TQ), :]
        row = t0 + jax.lax.broadcasted_iota(jnp.int32, (TQ, 1), 0)
        out_ref[...] = jnp.where(row < P, soft_rows, out_ref[...])


def soft_prompt_combined_embeds(source_ids, embed_table, soft_prompt, *, tq=128):
    """Returns combined_embeds of shape (B, P + S, D) (no padded output)."""
    B, S = source_ids.shape
    V, D = embed_table.shape
    P, D2 = soft_prompt.shape
    assert D == D2 and P >= 1

    dtype = embed_table.dtype
    soft_prompt = soft_prompt.astype(dtype)

    sub = _sublane_multiple(dtype)
    T = P + S
    TQ = max(sub, min(_round_up(tq, sub), _round_up(T, sub)))
    n_tiles = pl.cdiv(T, TQ)
    T_ids = n_tiles * TQ

    # ids at their *combined* row positions; soft rows and the pad rows of a
    # partial last tile hold 0 (gathered then overwritten / dropped).  Clipped
    # so a bad token id can never trigger an OOB DMA from the embedding table.
    ids = jnp.clip(source_ids, 0, V - 1).astype(jnp.int32)
    ids_full = jnp.zeros((B, T_ids), dtype=jnp.int32)
    ids_full = ids_full.at[:, P:P + S].set(ids)
    # 2D [B, T_ids] SMEM layout (long axis last) keeps scalar-prefetch padding
    # modest.  TODO(synk): for very large B*T, keep ids in HBM (pl.ANY) and DMA
    # the current tile's TQ ids into an SMEM scratch instead of prefetching all.

    # Soft prompt padded to a multiple of TQ so the kernel can take a (TQ, D)
    # slice at any soft-overlapping tile offset (padding is tiny: P*D).
    P_pad = _round_up(P, TQ)
    soft_pad = jnp.zeros((P_pad, D), dtype=dtype).at[:P, :].set(soft_prompt)

    kernel = functools.partial(_gather_concat_kernel, P, TQ)
    out = pl.pallas_call(
        kernel,
        # Exact output: no T_pad, no post-slice copy of the result.
        out_shape=jax.ShapeDtypeStruct((B, T, D), dtype),
        grid_spec=pltpu.PrefetchScalarGridSpec(
            num_scalar_prefetch=1,
            grid=(B, n_tiles),
            in_specs=[
                # Soft prompt: whole (P_pad, D) table resident in VMEM
                # (constant index_map -> fetched once, reused every step).
                pl.BlockSpec((P_pad, D), lambda b, t, ids: (0, 0)),
                # Embedding table stays in HBM; rows gathered via manual DMA.
                pl.BlockSpec(memory_space=pl.ANY),
            ],
            out_specs=pl.BlockSpec((None, TQ, D), lambda b, t, ids: (b, t, 0)),
            scratch_shapes=[
                pltpu.SemaphoreType.DMA((1,)),   # one sem per tile, one wait
            ],
        ),
        # Every output tile is written exactly once -> both grid axes parallel
        # (lets v7x's two TensorCores split the B x n_tiles space).
        # VMEM per step: 2*TQ*D*itemsize (double-buffered out) + P_pad*D
        # (resident soft prompt).  At TQ=128, D=4096 bf16 that is ~3 MB, well
        # under the scoped default on v5e/v6e/v7x; for larger TQ*D set
        # vmem_limit_bytes explicitly.
        compiler_params=pltpu.CompilerParams(
            dimension_semantics=("parallel", "parallel")),
    )(ids_full, soft_pad, embed_table)
    return out


def soft_prompt_forward(source_ids, source_mask, embed_table, soft_prompt, *, tq=128):
    """Mirrors SoftPromptModel.forward up to the base_model call.

    Returns (combined_embeds, combined_mask).
    """
    B, _ = source_ids.shape
    P, _ = soft_prompt.shape
    combined_embeds = soft_prompt_combined_embeds(
        source_ids, embed_table, soft_prompt, tq=tq)
    # Mask construction is trivial integer glue (ones + concat); plain JAX.
    soft_prompt_mask = jnp.ones((B, P), dtype=source_mask.dtype)
    combined_mask = jnp.concatenate([soft_prompt_mask, source_mask], axis=1)
    return combined_embeds, combined_mask


if __name__ == "__main__":
    # Small, module-consistent shapes.  tq=32 here gives 3 tiles per batch
    # element: a mixed soft+gather tile, a pure-gather tile, and a partial
    # last tile (T = 65 is not a multiple of TQ = 32).
    B = 2            # batch
    S = 45           # source sequence length
    P = 20           # soft_prompt_length (module default)
    D = 128          # embed_dim (base_model.config.d_model)
    V = 64           # vocab size of the (frozen) input embedding table

    key = jax.random.PRNGKey(0)
    k_ids, k_embed, k_soft = jax.random.split(key, 3)

    source_ids = jax.random.randint(k_ids, (B, S), 0, V, dtype=jnp.int32)
    source_mask = jnp.ones((B, S), dtype=jnp.int32)

    # Deterministic "parameters": frozen embedding table + learnable soft
    # prompt (torch.randn(P, D) * 0.1 analogue).
    embed_table = jax.random.normal(k_embed, (V, D), dtype=jnp.float32)
    soft_prompt = 0.1 * jax.random.normal(k_soft, (P, D), dtype=jnp.float32)

    combined_embeds, combined_mask = soft_prompt_forward(
        source_ids, source_mask, embed_table, soft_prompt, tq=32)
    combined_embeds = jax.block_until_ready(combined_embeds)
    combined_mask = jax.block_until_ready(combined_mask)

    # Reference check (pure JAX).
    ref_embeds = jnp.concatenate(
        [jnp.broadcast_to(soft_prompt[None], (B, P, D)),
         embed_table[jnp.clip(source_ids, 0, V - 1)]],
        axis=1)
    ref_mask = jnp.concatenate(
        [jnp.ones((B, P), dtype=source_mask.dtype), source_mask], axis=1)

    assert combined_embeds.shape == (B, P + S, D)
    assert combined_mask.shape == (B, P + S)
    assert jnp.allclose(combined_embeds, ref_embeds, atol=1e-6)
    assert jnp.array_equal(combined_mask, ref_mask)

    print("KERNEL_OK")
</pallas_src>

<mosaic_0001>
module attributes {stable_mosaic.version = 11 : i64} {
  func.func @_gather_concat_kernel(%arg0: i32, %arg1: i32, %arg2: memref<2x96xi32, #tpu.memory_space<smem>>, %arg3: memref<32x128xf32, #tpu.memory_space<vmem>>, %arg4: memref<64x128xf32, #tpu.memory_space<any>>, %arg5: memref<1x32x128xf32, #tpu.memory_space<vmem>>, %arg6: memref<1x!tpu.dma_semaphore, #tpu.memory_space<semaphore_mem>>) attributes {dimension_semantics = [#tpu.dimension_semantics<parallel>, #tpu.dimension_semantics<parallel>], iteration_bounds = array<i64: 2, 3>, scalar_prefetch = 1 : i64, scratch_operands = 1 : i64, tpu.core_type = #tpu.core_type<tc>, window_params = [{pipeline_mode = #tpu.pipeline_mode<synchronous>, transform_indices = @transform_0, window_bounds = array<i64: 32, 128>}, {}, {transform_indices = @transform_2, window_bounds = array<i64: 1, 32, 128>}]} {
    %c32_i32 = arith.constant 32 : i32
    %0 = arith.muli %arg1, %c32_i32 : i32
    %c32_i32_0 = arith.constant 32 : i32
    %1 = arith.addi %0, %c32_i32_0 : i32
    %c20_i32 = arith.constant 20 : i32
    %2 = arith.cmpi sgt, %1, %c20_i32 : i32
    %3 = arith.extui %2 : i1 to i32
    %c0_i32 = arith.constant 0 : i32
    %4 = arith.cmpi ne, %3, %c0_i32 : i32
    scf.if %4 {
      %c0_i32_3 = arith.constant 0 : i32
      %8 = arith.addi %0, %c0_i32_3 : i32
      %9 = arith.index_cast %arg0 : i32 to index
      %10 = arith.index_cast %8 : i32 to index
      %11 = memref.load %arg2[%9, %10] : memref<2x96xi32, #tpu.memory_space<smem>>
      %c0_i32_4 = arith.constant 0 : i32
      %c0_i32_5 = arith.constant 0 : i32
      %12 = tpu.memref_slice %arg4[%11, %c0_i32_5] : memref<64x128xf32, #tpu.memory_space<any>> -> memref<1x128xf32, #tpu.memory_space<any>>
      %c0_i32_6 = arith.constant 0 : i32
      %c0_i32_7 = arith.constant 0 : i32
      %c0_i32_8 = arith.constant 0 : i32
      %13 = tpu.memref_slice %arg5[%c0_i32_6, %c0_i32_7, %c0_i32_8] : memref<1x32x128xf32, #tpu.memory_space<vmem>> -> memref<1x1x128xf32, #tpu.memory_space<vmem>>
      %14 = tpu.memref_squeeze %13 : memref<1x1x128xf32, #tpu.memory_space<vmem>> -> memref<1x128xf32, #tpu.memory_space<vmem>>
      %15 = tpu.memref_slice %arg6[%c0_i32_4] : memref<1x!tpu.dma_semaphore, #tpu.memory_space<semaphore_mem>> -> memref<1x!tpu.dma_semaphore, #tpu.memory_space<semaphore_mem>>
      %16 = tpu.memref_squeeze %15 : memref<1x!tpu.dma_semaphore, #tpu.memory_space<semaphore_mem>> -> memref<!tpu.dma_semaphore, #tpu.memory_space<semaphore_mem>>
      tpu.enqueue_dma source(%12 : memref<1x128xf32, #tpu.memory_space<any>>) target(%14 : memref<1x128xf32, #tpu.memory_space<vmem>>) target_semaphore(%16 : memref<!tpu.dma_semaphore, #tpu.memory_space<semaphore_mem>>)
      %c1_i32 = arith.constant 1 : i32
      %17 = arith.addi %0, %c1_i32 : i32
      %18 = arith.index_cast %arg0 : i32 to index
      %19 = arith.index_cast %17 : i32 to index
      %20 = memref.load %arg2[%18, %19] : memref<2x96xi32, #tpu.memory_space<smem>>
      %c0_i32_9 = arith.constant 0 : i32
      %c0_i32_10 = arith.constant 0 : i32
      %21 = tpu.memref_slice %arg4[%20, %c0_i32_10] : memref<64x128xf32, #tpu.memory_space<any>> -> memref<1x128xf32, #tpu.memory_space<any>>
      %c0_i32_11 = arith.constant 0 : i32
      %c1_i32_12 = arith.constant 1 : i32
      %c0_i32_13 = arith.constant 0 : i32
      %22 = tpu.memref_slice %arg5[%c0_i32_11, %c1_i32_12, %c0_i32_13] : memref<1x32x128xf32, #tpu.memory_space<vmem>> -> memref<1x1x128xf32, #tpu.memory_space<vmem>>
      %23 = tpu.memref_squeeze %22 : memref<1x1x128xf32, #tpu.memory_space<vmem>> -> memref<1x128xf32, #tpu.memory_space<vmem>>
      %24 = tpu.memref_slice %arg6[%c0_i32_9] : memref<1x!tpu.dma_semaphore, #tpu.memory_space<semaphore_mem>> -> memref<1x!tpu.dma_semaphore, #tpu.memory_space<semaphore_mem>>
      %25 = tpu.memref_squeeze %24 : memref<1x!tpu.dma_semaphore, #tpu.memory_space<semaphore_mem>> -> memref<!tpu.dma_semaphore, #tpu.memory_space<semaphore_mem>>
      tpu.enqueue_dma source(%21 : memref<1x128xf32, #tpu.memory_space<any>>) target(%23 : memref<1x128xf32, #tpu.memory_space<vmem>>) target_semaphore(%25 : memref<!tpu.dma_semaphore, #tpu.memory_space<semaphore_mem>>)
      %c2_i32 = arith.constant 2 : i32
      %26 = arith.addi %0, %c2_i32 : i32
      %27 = arith.index_cast %arg0 : i32 to index
      %28 = arith.index_cast %26 : i32 to index
      %29 = memref.load %arg2[%27, %28] : memref<2x96xi32, #tpu.memory_space<smem>>
      %c0_i32_14 = arith.constant 0 : i32
      %c0_i32_15 = arith.constant 0 : i32
      %30 = tpu.memref_slice %arg4[%29, %c0_i32_15] : memref<64x128xf32, #tpu.memory_space<any>> -> memref<1x128xf32, #tpu.memory_space<any>>
      %c0_i32_16 = arith.constant 0 : i32
      %c2_i32_17 = arith.constant 2 : i32
      %c0_i32_18 = arith.constant 0 : i32
      %31 = tpu.memref_slice %arg5[%c0_i32_16, %c2_i32_17, %c0_i32_18] : memref<1x32x128xf32, #tpu.memory_space<vmem>> -> memref<1x1x128xf32, #tpu.memory_space<vmem>>
      %32 = tpu.memref_squeeze %31 : memref<1x1x128xf32, #tpu.memory_space<vmem>> -> memref<1x128xf32, #tpu.memory_space<vmem>>
      %33 = tpu.memref_slice %arg6[%c0_i32_14] : memref<1x!tpu.dma_semaphore, #tpu.memory_space<semaphore_mem>> -> memref<1x!tpu.dma_semaphore, #tpu.memory_space<semaphore_mem>>
      %34 = tpu.memref_squeeze %33 : memref<1x!tpu.dma_semaphore, #tpu.memory_space<semaphore_mem>> -> memref<!tpu.dma_semaphore, #tpu.memory_space<semaphore_mem>>
      tpu.enqueue_dma source(%30 : memref<1x128xf32, #tpu.memory_space<any>>) target(%32 : memref<1x128xf32, #tpu.memory_space<vmem>>) target_semaphore(%34 : memref<!tpu.dma_semaphore, #tpu.memory_space<semaphore_mem>>)
      %c3_i32 = arith.constant 3 : i32
      %35 = arith.addi %0, %c3_i32 : i32
      %36 = arith.index_cast %arg0 : i32 to index
      %37 = arith.index_cast %35 : i32 to index
      %38 = memref.load %arg2[%36, %37] : memref<2x96xi32, #tpu.memory_space<smem>>
      %c0_i32_19 = arith.constant 0 : i32
      %c0_i32_20 = arith.constant 0 : i32
      %39 = tpu.memref_slice %arg4[%38, %c0_i32_20] : memref<64x128xf32, #tpu.memory_space<any>> -> memref<1x128xf32, #tpu.memory_space<any>>
      %c0_i32_21 = arith.constant 0 : i32
      %c3_i32_22 = arith.constant 3 : i32
      %c0_i32_23 = arith.constant 0 : i32
      %40 = tpu.memref_slice %arg5[%c0_i32_21, %c3_i32_22, %c0_i32_23] : memref<1x32x128xf32, #tpu.memory_space<vmem>> -> memref<1x1x128xf32, #tpu.memory_space<vmem>>
      %41 = tpu.memref_squeeze %40 : memref<1x1x128xf32, #tpu.memory_space<vmem>> -> memref<1x128xf32, #tpu.memory_space<vmem>>
      %42 = tpu.memref_slice %arg6[%c0_i32_19] : memref<1x!tpu.dma_semaphore, #tpu.memory_space<semaphore_mem>> -> memref<1x!tpu.dma_semaphore, #tpu.memory_space<semaphore_mem>>
      %43 = tpu.memref_squeeze %42 : memref<1x!tpu.dma_semaphore, #tpu.memory_space<semaphore_mem>> -> memref<!tpu.dma_semaphore, #tpu.memory_space<semaphore_mem>>
      tpu.enqueue_dma source(%39 : memref<1x128xf32, #tpu.memory_space<any>>) target(%41 : memref<1x128xf32, #tpu.memory_space<vmem>>) target_semaphore(%43 : memref<!tpu.dma_semaphore, #tpu.memory_space<semaphore_mem>>)
      %c4_i32 = arith.constant 4 : i32
      %44 = arith.addi %0, %c4_i32 : i32
      %45 = arith.index_cast %arg0 : i32 to index
      %46 = arith.index_cast %44 : i32 to index
      %47 = memref.load %arg2[%45, %46] : memref<2x96xi32, #tpu.memory_space<smem>>
      %c0_i32_24 = arith.constant 0 : i32
      %c0_i32_25 = arith.constant 0 : i32
      %48 = tpu.memref_slice %arg4[%47, %c0_i32_25] : memref<64x128xf32, #tpu.memory_space<any>> -> memref<1x128xf32, #tpu.memory_space<any>>
      %c0_i32_26 = arith.constant 0 : i32
      %c4_i32_27 = arith.constant 4 : i32
      %c0_i32_28 = arith.constant 0 : i32
      %49 = tpu.memref_slice %arg5[%c0_i32_26, %c4_i32_27, %c0_i32_28] : memref<1x32x128xf32, #tpu.memory_space<vmem>> -> memref<1x1x128xf32, #tpu.memory_space<vmem>>
      %50 = tpu.memref_squeeze %49 : memref<1x1x128xf32, #tpu.memory_space<vmem>> -> memref<1x128xf32, #tpu.memory_space<vmem>>
      %51 = tpu.memref_slice %arg6[%c0_i32_24] : memref<1x!tpu.dma_semaphore, #tpu.memory_space<semaphore_mem>> -> memref<1x!tpu.dma_semaphore, #tpu.memory_space<semaphore_mem>>
      %52 = tpu.memref_squeeze %51 : memref<1x!tpu.dma_semaphore, #tpu.memory_space<semaphore_mem>> -> memref<!tpu.dma_semaphore, #tpu.memory_space<semaphore_mem>>
      tpu.enqueue_dma source(%48 : memref<1x128xf32, #tpu.memory_space<any>>) target(%50 : memref<1x128xf32, #tpu.memory_space<vmem>>) target_semaphore(%52 : memref<!tpu.dma_semaphore, #tpu.memory_space<semaphore_mem>>)
      %c5_i32 = arith.constant 5 : i32
      %53 = arith.addi %0, %c5_i32 : i32
      %54 = arith.index_cast %arg0 : i32 to index
      %55 = arith.index_cast %53 : i32 to index
      %56 = memref.load %arg2[%54, %55] : memref<2x96xi32, #tpu.memory_space<smem>>
      %c0_i32_29 = arith.constant 0 : i32
      %c0_i32_30 = arith.constant 0 : i32
      %57 = tpu.memref_slice %arg4[%56, %c0_i32_30] : memref<64x128xf32, #tpu.memory_space<any>> -> memref<1x128xf32, #tpu.memory_space<any>>
      %c0_i32_31 = arith.constant 0 : i32
      %c5_i32_32 = arith.constant 5 : i32
      %c0_i32_33 = arith.constant 0 : i32
      %58 = tpu.memref_slice %arg5[%c0_i32_31, %c5_i32_32, %c0_i32_33] : memref<1x32x128xf32, #tpu.memory_space<vmem>> -> memref<1x1x128xf32, #tpu.memory_space<vmem>>
      %59 = tpu.memref_squeeze %58 : memref<1x1x128xf32, #tpu.memory_space<vmem>> -> memref<1x128xf32, #tpu.memory_space<vmem>>
      %60 = tpu.memref_slice %arg6[%c0_i32_29] : memref<1x!tpu.dma_semaphore, #tpu.memory_space<semaphore_mem>> -> memref<1x!tpu.dma_semaphore, #tpu.memory_space<semaphore_mem>>
      %61 = tpu.memref_squeeze %60 : memref<1x!tpu.dma_semaphore, #tpu.memory_space<semaphore_mem>> -> memref<!tpu.dma_semaphore, #tpu.memory_space<semaphore_mem>>
      tpu.enqueue_dma source(%57 : memref<1x128xf32, #tpu.memory_space<any>>) target(%59 : memref<1x128xf32, #tpu.memory_space<vmem>>) target_semaphore(%61 : memref<!tpu.dma_semaphore, #tpu.memory_space<semaphore_mem>>)
      %c6_i32 = arith.constant 6 : i32
      %62 = arith.addi %0, %c6_i32 : i32
      %63 = arith.index_cast %arg0 : i32 to index
      %64 = arith.index_cast %62 : i32 to index
      %65 = memref.load %arg2[%63, %64] : memref<2x96xi32, #tpu.memory_space<smem>>
      %c0_i32_34 = arith.constant 0 : i32
      %c0_i32_35 = arith.constant 0 : i32
      %66 = tpu.memref_slice %arg4[%65, %c0_i32_35] : memref<64x128xf32, #tpu.memory_space<any>> -> memref<1x128xf32, #tpu.memory_space<any>>
      %c0_i32_36 = arith.constant 0 : i32
      %c6_i32_37 = arith.constant 6 : i32
      %c0_i32_38 = arith.constant 0 : i32
      %67 = tpu.memref_slice %arg5[%c0_i32_36, %c6_i32_37, %c0_i32_38] : memref<1x32x128xf32, #tpu.memory_space<vmem>> -> memref<1x1x128xf32, #tpu.memory_space<vmem>>
      %68 = tpu.memref_squeeze %67 : memref<1x1x128xf32, #tpu.memory_space<vmem>> -> memref<1x128xf32, #tpu.memory_space<vmem>>
      %69 = tpu.memref_slice %arg6[%c0_i32_34] : memref<1x!tpu.dma_semaphore, #tpu.memory_space<semaphore_mem>> -> memref<1x!tpu.dma_semaphore, #tpu.memory_space<semaphore_mem>>
      %70 = tpu.memref_squeeze %69 : memref<1x!tpu.dma_semaphore, #tpu.memory_space<semaphore_mem>> -> memref<!tpu.dma_semaphore, #tpu.memory_space<semaphore_mem>>
      tpu.enqueue_dma source(%66 : memref<1x128xf32, #tpu.memory_space<any>>) target(%68 : memref<1x128xf32, #tpu.memory_space<vmem>>) target_semaphore(%70 : memref<!tpu.dma_semaphore, #tpu.memory_space<semaphore_mem>>)
      %c7_i32 = arith.constant 7 : i32
      %71 = arith.addi %0, %c7_i32 : i32
      %72 = arith.index_cast %arg0 : i32 to index
      %73 = arith.index_cast %71 : i32 to index
      %74 = memref.load %arg2[%72, %73] : memref<2x96xi32, #tpu.memory_space<smem>>
      %c0_i32_39 = arith.constant 0 : i32
      %c0_i32_40 = arith.constant 0 : i32
      %75 = tpu.memref_slice %arg4[%74, %c0_i32_40] : memref<64x128xf32, #tpu.memory_space<any>> -> memref<1x128xf32, #tpu.memory_space<any>>
      %c0_i32_41 = arith.constant 0 : i32
      %c7_i32_42 = arith.constant 7 : i32
      %c0_i32_43 = arith.constant 0 : i32
      %76 = tpu.memref_slice %arg5[%c0_i32_41, %c7_i32_42, %c0_i32_43] : memref<1x32x128xf32, #tpu.memory_space<vmem>> -> memref<1x1x128xf32, #tpu.memory_space<vmem>>
      %77 = tpu.memref_squeeze %76 : memref<1x1x128xf32, #tpu.memory_space<vmem>> -> memref<1x128xf32, #tpu.memory_space<vmem>>
      %78 = tpu.memref_slice %arg6[%c0_i32_39] : memref<1x!tpu.dma_semaphore, #tpu.memory_space<semaphore_mem>> -> memref<1x!tpu.dma_semaphore, #tpu.memory_space<semaphore_mem>>
      %79 = tpu.memref_squeeze %78 : memref<1x!tpu.dma_semaphore, #tpu.memory_space<semaphore_mem>> -> memref<!tpu.dma_semaphore, #tpu.memory_space<semaphore_mem>>
      tpu.enqueue_dma source(%75 : memref<1x128xf32, #tpu.memory_space<any>>) target(%77 : memref<1x128xf32, #tpu.memory_space<vmem>>) target_semaphore(%79 : memref<!tpu.dma_semaphore, #tpu.memory_space<semaphore_mem>>)
      %c8_i32 = arith.constant 8 : i32
      %80 = arith.addi %0, %c8_i32 : i32
      %81 = arith.index_cast %arg0 : i32 to index
      %82 = arith.index_cast %80 : i32 to index
      %83 = memref.load %arg2[%81, %82] : memref<2x96xi32, #tpu.memory_space<smem>>
      %c0_i32_44 = arith.constant 0 : i32
      %c0_i32_45 = arith.constant 0 : i32
      %84 = tpu.memref_slice %arg4[%83, %c0_i32_45] : memref<64x128xf32, #tpu.memory_space<any>> -> memref<1x128xf32, #tpu.memory_space<any>>
      %c0_i32_46 = arith.constant 0 : i32
      %c8_i32_47 = arith.constant 8 : i32
      %c0_i32_48 = arith.constant 0 : i32
      %85 = tpu.memref_slice %arg5[%c0_i32_46, %c8_i32_47, %c0_i32_48] : memref<1x32x128xf32, #tpu.memory_space<vmem>> -> memref<1x1x128xf32, #tpu.memory_space<vmem>>
      %86 = tpu.memref_squeeze %85 : memref<1x1x128xf32, #tpu.memory_space<vmem>> -> memref<1x128xf32, #tpu.memory_space<vmem>>
      %87 = tpu.memref_slice %arg6[%c0_i32_44] : memref<1x!tpu.dma_semaphore, #tpu.memory_space<semaphore_mem>> -> memref<1x!tpu.dma_semaphore, #tpu.memory_space<semaphore_mem>>
      %88 = tpu.memref_squeeze %87 : memref<1x!tpu.dma_semaphore, #tpu.memory_space<semaphore_mem>> -> memref<!tpu.dma_semaphore, #tpu.memory_space<semaphore_mem>>
      tpu.enqueue_dma source(%84 : memref<1x128xf32, #tpu.memory_space<any>>) target(%86 : memref<1x128xf32, #tpu.memory_space<vmem>>) target_semaphore(%88 : memref<!tpu.dma_semaphore, #tpu.memory_space<semaphore_mem>>)
      %c9_i32 = arith.constant 9 : i32
      %89 = arith.addi %0, %c9_i32 : i32
      %90 = arith.index_cast %arg0 : i32 to index
      %91 = arith.index_cast %89 : i32 to index
      %92 = memref.load %arg2[%90, %91] : memref<2x96xi32, #tpu.memory_space<smem>>
      %c0_i32_49 = arith.constant 0 : i32
      %c0_i32_50 = arith.constant 0 : i32
      %93 = tpu.memref_slice %arg4[%92, %c0_i32_50] : memref<64x128xf32, #tpu.memory_space<any>> -> memref<1x128xf32, #tpu.memory_space<any>>
      %c0_i32_51 = arith.constant 0 : i32
      %c9_i32_52 = arith.constant 9 : i32
      %c0_i32_53 = arith.constant 0 : i32
      %94 = tpu.memref_slice %arg5[%c0_i32_51, %c9_i32_52, %c0_i32_53] : memref<1x32x128xf32, #tpu.memory_space<vmem>> -> memref<1x1x128xf32, #tpu.memory_space<vmem>>
      %95 = tpu.memref_squeeze %94 : memref<1x1x128xf32, #tpu.memory_space<vmem>> -> memref<1x128xf32, #tpu.memory_space<vmem>>
      %96 = tpu.memref_slice %arg6[%c0_i32_49] : memref<1x!tpu.dma_semaphore, #tpu.memory_space<semaphore_mem>> -> memref<1x!tpu.dma_semaphore, #tpu.memory_space<semaphore_mem>>
      %97 = tpu.memref_squeeze %96 : memref<1x!tpu.dma_semaphore, #tpu.memory_space<semaphore_mem>> -> memref<!tpu.dma_semaphore, #tpu.memory_space<semaphore_mem>>
      tpu.enqueue_dma source(%93 : memref<1x128xf32, #tpu.memory_space<any>>) target(%95 : memref<1x128xf32, #tpu.memory_space<vmem>>) target_semaphore(%97 : memref<!tpu.dma_semaphore, #tpu.memory_space<semaphore_mem>>)
      %c10_i32 = arith.constant 10 : i32
      %98 = arith.addi %0, %c10_i32 : i32
      %99 = arith.index_cast %arg0 : i32 to index
      %100 = arith.index_cast %98 : i32 to index
      %101 = memref.load %arg2[%99, %100] : memref<2x96xi32, #tpu.memory_space<smem>>
      %c0_i32_54 = arith.constant 0 : i32
      %c0_i32_55 = arith.constant 0 : i32
      %102 = tpu.memref_slice %arg4[%101, %c0_i32_55] : memref<64x128xf32, #tpu.memory_space<any>> -> memref<1x128xf32, #tpu.memory_space<any>>
      %c0_i32_56 = arith.constant 0 : i32
      %c10_i32_57 = arith.constant 10 : i32
      %c0_i32_58 = arith.constant 0 : i32
      %103 = tpu.memref_slice %arg5[%c0_i32_56, %c10_i32_57, %c0_i32_58] : memref<1x32x128xf32, #tpu.memory_space<vmem>> -> memref<1x1x128xf32, #tpu.memory_space<vmem>>
      %104 = tpu.memref_squeeze %103 : memref<1x1x128xf32, #tpu.memory_space<vmem>> -> memref<1x128xf32, #tpu.memory_space<vmem>>
      %105 = tpu.memref_slice %arg6[%c0_i32_54] : memref<1x!tpu.dma_semaphore, #tpu.memory_space<semaphore_mem>> -> memref<1x!tpu.dma_semaphore, #tpu.memory_space<semaphore_mem>>
      %106 = tpu.memref_squeeze %105 : memref<1x!tpu.dma_semaphore, #tpu.memory_space<semaphore_mem>> -> memref<!tpu.dma_semaphore, #tpu.memory_space<semaphore_mem>>
      tpu.enqueue_dma source(%102 : memref<1x128xf32, #tpu.memory_space<any>>) target(%104 : memref<1x128xf32, #tpu.memory_space<vmem>>) target_semaphore(%106 : memref<!tpu.dma_semaphore, #tpu.memory_space<semaphore_mem>>)
      %c11_i32 = arith.constant 11 : i32
      %107 = arith.addi %0, %c11_i32 : i32
      %108 = arith.index_cast %arg0 : i32 to index
      %109 = arith.index_cast %107 : i32 to index
      %110 = memref.load %arg2[%108, %109] : memref<2x96xi32, #tpu.memory_space<smem>>
      %c0_i32_59 = arith.constant 0 : i32
      %c0_i32_60 = arith.constant 0 : i32
      %111 = tpu.memref_slice %arg4[%110, %c0_i32_60] : memref<64x128xf32, #tpu.memory_space<any>> -> memref<1x128xf32, #tpu.memory_space<any>>
      %c0_i32_61 = arith.constant 0 : i32
      %c11_i32_62 = arith.constant 11 : i32
      %c0_i32_63 = arith.constant 0 : i32
      %112 = tpu.memref_slice %arg5[%c0_i32_61, %c11_i32_62, %c0_i32_63] : memref<1x32x128xf32, #tpu.memory_space<vmem>> -> memref<1x1x128xf32, #tpu.memory_space<vmem>>
      %113 = tpu.memref_squeeze %112 : memref<1x1x128xf32, #tpu.memory_space<vmem>> -> memref<1x128xf32, #tpu.memory_space<vmem>>
      %114 = tpu.memref_slice %arg6[%c0_i32_59] : memref<1x!tpu.dma_semaphore, #tpu.memory_space<semaphore_mem>> -> memref<1x!tpu.dma_semaphore, #tpu.memory_space<semaphore_mem>>
      %115 = tpu.memref_squeeze %114 : memref<1x!tpu.dma_semaphore, #tpu.memory_space<semaphore_mem>> -> memref<!tpu.dma_semaphore, #tpu.memory_space<semaphore_mem>>
      tpu.enqueue_dma source(%111 : memref<1x128xf32, #tpu.memory_space<any>>) target(%113 : memref<1x128xf32, #tpu.memory_space<vmem>>) target_semaphore(%115 : memref<!tpu.dma_semaphore, #tpu.memory_space<semaphore_mem>>)
      %c12_i32 = arith.constant 12 : i32
      %116 = arith.addi %0, %c12_i32 : i32
      %117 = arith.index_cast %arg0 : i32 to index
      %118 = arith.index_cast %116 : i32 to index
      %119 = memref.load %arg2[%117, %118] : memref<2x96xi32, #tpu.memory_space<smem>>
      %c0_i32_64 = arith.constant 0 : i32
      %c0_i32_65 = arith.constant 0 : i32
      %120 = tpu.memref_slice %arg4[%119, %c0_i32_65] : memref<64x128xf32, #tpu.memory_space<any>> -> memref<1x128xf32, #tpu.memory_space<any>>
      %c0_i32_66 = arith.constant 0 : i32
      %c12_i32_67 = arith.constant 12 : i32
      %c0_i32_68 = arith.constant 0 : i32
      %121 = tpu.memref_slice %arg5[%c0_i32_66, %c12_i32_67, %c0_i32_68] : memref<1x32x128xf32, #tpu.memory_space<vmem>> -> memref<1x1x128xf32, #tpu.memory_space<vmem>>
      %122 = tpu.memref_squeeze %121 : memref<1x1x128xf32, #tpu.memory_space<vmem>> -> memref<1x128xf32, #tpu.memory_space<vmem>>
      %123 = tpu.memref_slice %arg6[%c0_i32_64] : memref<1x!tpu.dma_semaphore, #tpu.memory_space<semaphore_mem>> -> memref<1x!tpu.dma_semaphore, #tpu.memory_space<semaphore_mem>>
      %124 = tpu.memref_squeeze %123 : memref<1x!tpu.dma_semaphore, #tpu.memory_space<semaphore_mem>> -> memref<!tpu.dma_semaphore, #tpu.memory_space<semaphore_mem>>
      tpu.enqueue_dma source(%120 : memref<1x128xf32, #tpu.memory_space<any>>) target(%122 : memref<1x128xf32, #tpu.memory_space<vmem>>) target_semaphore(%124 : memref<!tpu.dma_semaphore, #tpu.memory_space<semaphore_mem>>)
      %c13_i32 = arith.constant 13 : i32
      %125 = arith.addi %0, %c13_i32 : i32
      %126 = arith.index_cast %arg0 : i32 to index
      %127 = arith.index_cast %125 : i32 to index
      %128 = memref.load %arg2[%126, %127] : memref<2x96xi32, #tpu.memory_space<smem>>
      %c0_i32_69 = arith.constant 0 : i32
      %c0_i32_70 = arith.constant 0 : i32
      %129 = tpu.memref_slice %arg4[%128, %c0_i32_70] : memref<64x128xf32, #tpu.memory_space<any>> -> memref<1x128xf32, #tpu.memory_space<any>>
      %c0_i32_71 = arith.constant 0 : i32
      %c13_i32_72 = arith.constant 13 : i32
      %c0_i32_73 = arith.constant 0 : i32
      %130 = tpu.memref_slice %arg5[%c0_i32_71, %c13_i32_72, %c0_i32_73] : memref<1x32x128xf32, #tpu.memory_space<vmem>> -> memref<1x1x128xf32, #tpu.memory_space<vmem>>
      %131 = tpu.memref_squeeze %130 : memref<1x1x128xf32, #tpu.memory_space<vmem>> -> memref<1x128xf32, #tpu.memory_space<vmem>>
      %132 = tpu.memref_slice %arg6[%c0_i32_69] : memref<1x!tpu.dma_semaphore, #tpu.memory_space<semaphore_mem>> -> memref<1x!tpu.dma_semaphore, #tpu.memory_space<semaphore_mem>>
      %133 = tpu.memref_squeeze %132 : memref<1x!tpu.dma_semaphore, #tpu.memory_space<semaphore_mem>> -> memref<!tpu.dma_semaphore, #tpu.memory_space<semaphore_mem>>
      tpu.enqueue_dma source(%129 : memref<1x128xf32, #tpu.memory_space<any>>) target(%131 : memref<1x128xf32, #tpu.memory_space<vmem>>) target_semaphore(%133 : memref<!tpu.dma_semaphore, #tpu.memory_space<semaphore_mem>>)
      %c14_i32 = arith.constant 14 : i32
      %134 = arith.addi %0, %c14_i32 : i32
      %135 = arith.index_cast %arg0 : i32 to index
      %136 = arith.index_cast %134 : i32 to index
      %137 = memref.load %arg2[%135, %136] : memref<2x96xi32, #tpu.memory_space<smem>>
      %c0_i32_74 = arith.constant 0 : i32
      %c0_i32_75 = arith.constant 0 : i32
      %138 = tpu.memref_slice %arg4[%137, %c0_i32_75] : memref<64x128xf32, #tpu.memory_space<any>> -> memref<1x128xf32, #tpu.memory_space<any>>
      %c0_i32_76 = arith.constant 0 : i32
      %c14_i32_77 = arith.constant 14 : i32
      %c0_i32_78 = arith.constant 0 : i32
      %139 = tpu.memref_slice %arg5[%c0_i32_76, %c14_i32_77, %c0_i32_78] : memref<1x32x128xf32, #tpu.memory_space<vmem>> -> memref<1x1x128xf32, #tpu.memory_space<vmem>>
      %140 = tpu.memref_squeeze %139 : memref<1x1x128xf32, #tpu.memory_space<vmem>> -> memref<1x128xf32, #tpu.memory_space<vmem>>
      %141 = tpu.memref_slice %arg6[%c0_i32_74] : memref<1x!tpu.dma_semaphore, #tpu.memory_space<semaphore_mem>> -> memref<1x!tpu.dma_semaphore, #tpu.memory_space<semaphore_mem>>
      %142 = tpu.memref_squeeze %141 : memref<1x!tpu.dma_semaphore, #tpu.memory_space<semaphore_mem>> -> memref<!tpu.dma_semaphore, #tpu.memory_space<semaphore_mem>>
      tpu.enqueue_dma source(%138 : memref<1x128xf32, #tpu.memory_space<any>>) target(%140 : memref<1x128xf32, #tpu.memory_space<vmem>>) target_semaphore(%142 : memref<!tpu.dma_semaphore, #tpu.memory_space<semaphore_mem>>)
      %c15_i32 = arith.constant 15 : i32
      %143 = arith.addi %0, %c15_i32 : i32
      %144 = arith.index_cast %arg0 : i32 to index
      %145 = arith.index_cast %143 : i32 to index
      %146 = memref.load %arg2[%144, %145] : memref<2x96xi32, #tpu.memory_space<smem>>
      %c0_i32_79 = arith.constant 0 : i32
      %c0_i32_80 = arith.constant 0 : i32
      %147 = tpu.memref_slice %arg4[%146, %c0_i32_80] : memref<64x128xf32, #tpu.memory_space<any>> -> memref<1x128xf32, #tpu.memory_space<any>>
      %c0_i32_81 = arith.constant 0 : i32
      %c15_i32_82 = arith.constant 15 : i32
      %c0_i32_83 = arith.constant 0 : i32
      %148 = tpu.memref_slice %arg5[%c0_i32_81, %c15_i32_82, %c0_i32_83] : memref<1x32x128xf32, #tpu.memory_space<vmem>> -> memref<1x1x128xf32, #tpu.memory_space<vmem>>
      %149 = tpu.memref_squeeze %148 : memref<1x1x128xf32, #tpu.memory_space<vmem>> -> memref<1x128xf32, #tpu.memory_space<vmem>>
      %150 = tpu.memref_slice %arg6[%c0_i32_79] : memref<1x!tpu.dma_semaphore, #tpu.memory_space<semaphore_mem>> -> memref<1x!tpu.dma_semaphore, #tpu.memory_space<semaphore_mem>>
      %151 = tpu.memref_squeeze %150 : memref<1x!tpu.dma_semaphore, #tpu.memory_space<semaphore_mem>> -> memref<!tpu.dma_semaphore, #tpu.memory_space<semaphore_mem>>
      tpu.enqueue_dma source(%147 : memref<1x128xf32, #tpu.memory_space<any>>) target(%149 : memref<1x128xf32, #tpu.memory_space<vmem>>) target_semaphore(%151 : memref<!tpu.dma_semaphore, #tpu.memory_space<semaphore_mem>>)
      %c16_i32 = arith.constant 16 : i32
      %152 = arith.addi %0, %c16_i32 : i32
      %153 = arith.index_cast %arg0 : i32 to index
      %154 = arith.index_cast %152 : i32 to index
      %155 = memref.load %arg2[%153, %154] : memref<2x96xi32, #tpu.memory_space<smem>>
      %c0_i32_84 = arith.constant 0 : i32
      %c0_i32_85 = arith.constant 0 : i32
      %156 = tpu.memref_slice %arg4[%155, %c0_i32_85] : memref<64x128xf32, #tpu.memory_space<any>> -> memref<1x128xf32, #tpu.memory_space<any>>
      %c0_i32_86 = arith.constant 0 : i32
      %c16_i32_87 = arith.constant 16 : i32
      %c0_i32_88 = arith.constant 0 : i32
      %157 = tpu.memref_slice %arg5[%c0_i32_86, %c16_i32_87, %c0_i32_88] : memref<1x32x128xf32, #tpu.memory_space<vmem>> -> memref<1x1x128xf32, #tpu.memory_space<vmem>>
      %158 = tpu.memref_squeeze %157 : memref<1x1x128xf32, #tpu.memory_space<vmem>> -> memref<1x128xf32, #tpu.memory_space<vmem>>
      %159 = tpu.memref_slice %arg6[%c0_i32_84] : memref<1x!tpu.dma_semaphore, #tpu.memory_space<semaphore_mem>> -> memref<1x!tpu.dma_semaphore, #tpu.memory_space<semaphore_mem>>
      %160 = tpu.memref_squeeze %159 : memref<1x!tpu.dma_semaphore, #tpu.memory_space<semaphore_mem>> -> memref<!tpu.dma_semaphore, #tpu.memory_space<semaphore_mem>>
      tpu.enqueue_dma source(%156 : memref<1x128xf32, #tpu.memory_space<any>>) target(%158 : memref<1x128xf32, #tpu.memory_space<vmem>>) target_semaphore(%160 : memref<!tpu.dma_semaphore, #tpu.memory_space<semaphore_mem>>)
      %c17_i32 = arith.constant 17 : i32
      %161 = arith.addi %0, %c17_i32 : i32
      %162 = arith.index_cast %arg0 : i32 to index
      %163 = arith.index_cast %161 : i32 to index
      %164 = memref.load %arg2[%162, %163] : memref<2x96xi32, #tpu.memory_space<smem>>
      %c0_i32_89 = arith.constant 0 : i32
      %c0_i32_90 = arith.constant 0 : i32
      %165 = tpu.memref_slice %arg4[%164, %c0_i32_90] : memref<64x128xf32, #tpu.memory_space<any>> -> memref<1x128xf32, #tpu.memory_space<any>>
      %c0_i32_91 = arith.constant 0 : i32
      %c17_i32_92 = arith.constant 17 : i32
      %c0_i32_93 = arith.constant 0 : i32
      %166 = tpu.memref_slice %arg5[%c0_i32_91, %c17_i32_92, %c0_i32_93] : memref<1x32x128xf32, #tpu.memory_space<vmem>> -> memref<1x1x128xf32, #tpu.memory_space<vmem>>
      %167 = tpu.memref_squeeze %166 : memref<1x1x128xf32, #tpu.memory_space<vmem>> -> memref<1x128xf32, #tpu.memory_space<vmem>>
      %168 = tpu.memref_slice %arg6[%c0_i32_89] : memref<1x!tpu.dma_semaphore, #tpu.memory_space<semaphore_mem>> -> memref<1x!tpu.dma_semaphore, #tpu.memory_space<semaphore_mem>>
      %169 = tpu.memref_squeeze %168 : memref<1x!tpu.dma_semaphore, #tpu.memory_space<semaphore_mem>> -> memref<!tpu.dma_semaphore, #tpu.memory_space<semaphore_mem>>
      tpu.enqueue_dma source(%165 : memref<1x128xf32, #tpu.memory_space<any>>) target(%167 : memref<1x128xf32, #tpu.memory_space<vmem>>) target_semaphore(%169 : memref<!tpu.dma_semaphore, #tpu.memory_space<semaphore_mem>>)
      %c18_i32 = arith.constant 18 : i32
      %170 = arith.addi %0, %c18_i32 : i32
      %171 = arith.index_cast %arg0 : i32 to index
      %172 = arith.index_cast %170 : i32 to index
      %173 = memref.load %arg2[%171, %172] : memref<2x96xi32, #tpu.memory_space<smem>>
      %c0_i32_94 = arith.constant 0 : i32
      %c0_i32_95 = arith.constant 0 : i32
      %174 = tpu.memref_slice %arg4[%173, %c0_i32_95] : memref<64x128xf32, #tpu.memory_space<any>> -> memref<1x128xf32, #tpu.memory_space<any>>
      %c0_i32_96 = arith.constant 0 : i32
      %c18_i32_97 = arith.constant 18 : i32
      %c0_i32_98 = arith.constant 0 : i32
      %175 = tpu.memref_slice %arg5[%c0_i32_96, %c18_i32_97, %c0_i32_98] : memref<1x32x128xf32, #tpu.memory_space<vmem>> -> memref<1x1x128xf32, #tpu.memory_space<vmem>>
      %176 = tpu.memref_squeeze %175 : memref<1x1x128xf32, #tpu.memory_space<vmem>> -> memref<1x128xf32, #tpu.memory_space<vmem>>
      %177 = tpu.memref_slice %arg6[%c0_i32_94] : memref<1x!tpu.dma_semaphore, #tpu.memory_space<semaphore_mem>> -> memref<1x!tpu.dma_semaphore, #tpu.memory_space<semaphore_mem>>
      %178 = tpu.memref_squeeze %177 : memref<1x!tpu.dma_semaphore, #tpu.memory_space<semaphore_mem>> -> memref<!tpu.dma_semaphore, #tpu.memory_space<semaphore_mem>>
      tpu.enqueue_dma source(%174 : memref<1x128xf32, #tpu.memory_space<any>>) target(%176 : memref<1x128xf32, #tpu.memory_space<vmem>>) target_semaphore(%178 : memref<!tpu.dma_semaphore, #tpu.memory_space<semaphore_mem>>)
      %c19_i32 = arith.constant 19 : i32
      %179 = arith.addi %0, %c19_i32 : i32
      %180 = arith.index_cast %arg0 : i32 to index
      %181 = arith.index_cast %179 : i32 to index
      %182 = memref.load %arg2[%180, %181] : memref<2x96xi32, #tpu.memory_space<smem>>
      %c0_i32_99 = arith.constant 0 : i32
      %c0_i32_100 = arith.constant 0 : i32
      %183 = tpu.memref_slice %arg4[%182, %c0_i32_100] : memref<64x128xf32, #tpu.memory_space<any>> -> memref<1x128xf32, #tpu.memory_space<any>>
      %c0_i32_101 = arith.constant 0 : i32
      %c19_i32_102 = arith.constant 19 : i32
      %c0_i32_103 = arith.constant 0 : i32
      %184 = tpu.memref_slice %arg5[%c0_i32_101, %c19_i32_102, %c0_i32_103] : memref<1x32x128xf32, #tpu.memory_space<vmem>> -> memref<1x1x128xf32, #tpu.memory_space<vmem>>
      %185 = tpu.memref_squeeze %184 : memref<1x1x128xf32, #tpu.memory_space<vmem>> -> memref<1x128xf32, #tpu.memory_space<vmem>>
      %186 = tpu.memref_slice %arg6[%c0_i32_99] : memref<1x!tpu.dma_semaphore, #tpu.memory_space<semaphore_mem>> -> memref<1x!tpu.dma_semaphore, #tpu.memory_space<semaphore_mem>>
      %187 = tpu.memref_squeeze %186 : memref<1x!tpu.dma_semaphore, #tpu.memory_space<semaphore_mem>> -> memref<!tpu.dma_semaphore, #tpu.memory_space<semaphore_mem>>
      tpu.enqueue_dma source(%183 : memref<1x128xf32, #tpu.memory_space<any>>) target(%185 : memref<1x128xf32, #tpu.memory_space<vmem>>) target_semaphore(%187 : memref<!tpu.dma_semaphore, #tpu.memory_space<semaphore_mem>>)
      %c20_i32_104 = arith.constant 20 : i32
      %188 = arith.addi %0, %c20_i32_104 : i32
      %189 = arith.index_cast %arg0 : i32 to index
      %190 = arith.index_cast %188 : i32 to index
      %191 = memref.load %arg2[%189, %190] : memref<2x96xi32, #tpu.memory_space<smem>>
      %c0_i32_105 = arith.constant 0 : i32
      %c0_i32_106 = arith.constant 0 : i32
      %192 = tpu.memref_slice %arg4[%191, %c0_i32_106] : memref<64x128xf32, #tpu.memory_space<any>> -> memref<1x128xf32, #tpu.memory_space<any>>
      %c0_i32_107 = arith.constant 0 : i32
      %c20_i32_108 = arith.constant 20 : i32
      %c0_i32_109 = arith.constant 0 : i32
      %193 = tpu.memref_slice %arg5[%c0_i32_107, %c20_i32_108, %c0_i32_109] : memref<1x32x128xf32, #tpu.memory_space<vmem>> -> memref<1x1x128xf32, #tpu.memory_space<vmem>>
      %194 = tpu.memref_squeeze %193 : memref<1x1x128xf32, #tpu.memory_space<vmem>> -> memref<1x128xf32, #tpu.memory_space<vmem>>
      %195 = tpu.memref_slice %arg6[%c0_i32_105] : memref<1x!tpu.dma_semaphore, #tpu.memory_space<semaphore_mem>> -> memref<1x!tpu.dma_semaphore, #tpu.memory_space<semaphore_mem>>
      %196 = tpu.memref_squeeze %195 : memref<1x!tpu.dma_semaphore, #tpu.memory_space<semaphore_mem>> -> memref<!tpu.dma_semaphore, #tpu.memory_space<semaphore_mem>>
      tpu.enqueue_dma source(%192 : memref<1x128xf32, #tpu.memory_space<any>>) target(%194 : memref<1x128xf32, #tpu.memory_space<vmem>>) target_semaphore(%196 : memref<!tpu.dma_semaphore, #tpu.memory_space<semaphore_mem>>)
      %c21_i32 = arith.constant 21 : i32
      %197 = arith.addi %0, %c21_i32 : i32
      %198 = arith.index_cast %arg0 : i32 to index
      %199 = arith.index_cast %197 : i32 to index
      %200 = memref.load %arg2[%198, %199] : memref<2x96xi32, #tpu.memory_space<smem>>
      %c0_i32_110 = arith.constant 0 : i32
      %c0_i32_111 = arith.constant 0 : i32
      %201 = tpu.memref_slice %arg4[%200, %c0_i32_111] : memref<64x128xf32, #tpu.memory_space<any>> -> memref<1x128xf32, #tpu.memory_space<any>>
      %c0_i32_112 = arith.constant 0 : i32
      %c21_i32_113 = arith.constant 21 : i32
      %c0_i32_114 = arith.constant 0 : i32
      %202 = tpu.memref_slice %arg5[%c0_i32_112, %c21_i32_113, %c0_i32_114] : memref<1x32x128xf32, #tpu.memory_space<vmem>> -> memref<1x1x128xf32, #tpu.memory_space<vmem>>
      %203 = tpu.memref_squeeze %202 : memref<1x1x128xf32, #tpu.memory_space<vmem>> -> memref<1x128xf32, #tpu.memory_space<vmem>>
      %204 = tpu.memref_slice %arg6[%c0_i32_110] : memref<1x!tpu.dma_semaphore, #tpu.memory_space<semaphore_mem>> -> memref<1x!tpu.dma_semaphore, #tpu.memory_space<semaphore_mem>>
      %205 = tpu.memref_squeeze %204 : memref<1x!tpu.dma_semaphore, #tpu.memory_space<semaphore_mem>> -> memref<!tpu.dma_semaphore, #tpu.memory_space<semaphore_mem>>
      tpu.enqueue_dma source(%201 : memref<1x128xf32, #tpu.memory_space<any>>) target(%203 : memref<1x128xf32, #tpu.memory_space<vmem>>) target_semaphore(%205 : memref<!tpu.dma_semaphore, #tpu.memory_space<semaphore_mem>>)
      %c22_i32 = arith.constant 22 : i32
      %206 = arith.addi %0, %c22_i32 : i32
      %207 = arith.index_cast %arg0 : i32 to index
      %208 = arith.index_cast %206 : i32 to index
      %209 = memref.load %arg2[%207, %208] : memref<2x96xi32, #tpu.memory_space<smem>>
      %c0_i32_115 = arith.constant 0 : i32
      %c0_i32_116 = arith.constant 0 : i32
      %210 = tpu.memref_slice %arg4[%209, %c0_i32_116] : memref<64x128xf32, #tpu.memory_space<any>> -> memref<1x128xf32, #tpu.memory_space<any>>
      %c0_i32_117 = arith.constant 0 : i32
      %c22_i32_118 = arith.constant 22 : i32
      %c0_i32_119 = arith.constant 0 : i32
      %211 = tpu.memref_slice %arg5[%c0_i32_117, %c22_i32_118, %c0_i32_119] : memref<1x32x128xf32, #tpu.memory_space<vmem>> -> memref<1x1x128xf32, #tpu.memory_space<vmem>>
      %212 = tpu.memref_squeeze %211 : memref<1x1x128xf32, #tpu.memory_space<vmem>> -> memref<1x128xf32, #tpu.memory_space<vmem>>
      %213 = tpu.memref_slice %arg6[%c0_i32_115] : memref<1x!tpu.dma_semaphore, #tpu.memory_space<semaphore_mem>> -> memref<1x!tpu.dma_semaphore, #tpu.memory_space<semaphore_mem>>
      %214 = tpu.memref_squeeze %213 : memref<1x!tpu.dma_semaphore, #tpu.memory_space<semaphore_mem>> -> memref<!tpu.dma_semaphore, #tpu.memory_space<semaphore_mem>>
      tpu.enqueue_dma source(%210 : memref<1x128xf32, #tpu.memory_space<any>>) target(%212 : memref<1x128xf32, #tpu.memory_space<vmem>>) target_semaphore(%214 : memref<!tpu.dma_semaphore, #tpu.memory_space<semaphore_mem>>)
      %c23_i32 = arith.constant 23 : i32
      %215 = arith.addi %0, %c23_i32 : i32
      %216 = arith.index_cast %arg0 : i32 to index
      %217 = arith.index_cast %215 : i32 to index
      %218 = memref.load %arg2[%216, %217] : memref<2x96xi32, #tpu.memory_space<smem>>
      %c0_i32_120 = arith.constant 0 : i32
      %c0_i32_121 = arith.constant 0 : i32
      %219 = tpu.memref_slice %arg4[%218, %c0_i32_121] : memref<64x128xf32, #tpu.memory_space<any>> -> memref<1x128xf32, #tpu.memory_space<any>>
      %c0_i32_122 = arith.constant 0 : i32
      %c23_i32_123 = arith.constant 23 : i32
      %c0_i32_124 = arith.constant 0 : i32
      %220 = tpu.memref_slice %arg5[%c0_i32_122, %c23_i32_123, %c0_i32_124] : memref<1x32x128xf32, #tpu.memory_space<vmem>> -> memref<1x1x128xf32, #tpu.memory_space<vmem>>
      %221 = tpu.memref_squeeze %220 : memref<1x1x128xf32, #tpu.memory_space<vmem>> -> memref<1x128xf32, #tpu.memory_space<vmem>>
      %222 = tpu.memref_slice %arg6[%c0_i32_120] : memref<1x!tpu.dma_semaphore, #tpu.memory_space<semaphore_mem>> -> memref<1x!tpu.dma_semaphore, #tpu.memory_space<semaphore_mem>>
      %223 = tpu.memref_squeeze %222 : memref<1x!tpu.dma_semaphore, #tpu.memory_space<semaphore_mem>> -> memref<!tpu.dma_semaphore, #tpu.memory_space<semaphore_mem>>
      tpu.enqueue_dma source(%219 : memref<1x128xf32, #tpu.memory_space<any>>) target(%221 : memref<1x128xf32, #tpu.memory_space<vmem>>) target_semaphore(%223 : memref<!tpu.dma_semaphore, #tpu.memory_space<semaphore_mem>>)
      %c24_i32 = arith.constant 24 : i32
      %224 = arith.addi %0, %c24_i32 : i32
      %225 = arith.index_cast %arg0 : i32 to index
      %226 = arith.index_cast %224 : i32 to index
      %227 = memref.load %arg2[%225, %226] : memref<2x96xi32, #tpu.memory_space<smem>>
      %c0_i32_125 = arith.constant 0 : i32
      %c0_i32_126 = arith.constant 0 : i32
      %228 = tpu.memref_slice %arg4[%227, %c0_i32_126] : memref<64x128xf32, #tpu.memory_space<any>> -> memref<1x128xf32, #tpu.memory_space<any>>
      %c0_i32_127 = arith.constant 0 : i32
      %c24_i32_128 = arith.constant 24 : i32
      %c0_i32_129 = arith.constant 0 : i32
      %229 = tpu.memref_slice %arg5[%c0_i32_127, %c24_i32_128, %c0_i32_129] : memref<1x32x128xf32, #tpu.memory_space<vmem>> -> memref<1x1x128xf32, #tpu.memory_space<vmem>>
      %230 = tpu.memref_squeeze %229 : memref<1x1x128xf32, #tpu.memory_space<vmem>> -> memref<1x128xf32, #tpu.memory_space<vmem>>
      %231 = tpu.memref_slice %arg6[%c0_i32_125] : memref<1x!tpu.dma_semaphore, #tpu.memory_space<semaphore_mem>> -> memref<1x!tpu.dma_semaphore, #tpu.memory_space<semaphore_mem>>
      %232 = tpu.memref_squeeze %231 : memref<1x!tpu.dma_semaphore, #tpu.memory_space<semaphore_mem>> -> memref<!tpu.dma_semaphore, #tpu.memory_space<semaphore_mem>>
      tpu.enqueue_dma source(%228 : memref<1x128xf32, #tpu.memory_space<any>>) target(%230 : memref<1x128xf32, #tpu.memory_space<vmem>>) target_semaphore(%232 : memref<!tpu.dma_semaphore, #tpu.memory_space<semaphore_mem>>)
      %c25_i32 = arith.constant 25 : i32
      %233 = arith.addi %0, %c25_i32 : i32
      %234 = arith.index_cast %arg0 : i32 to index
      %235 = arith.index_cast %233 : i32 to index
      %236 = memref.load %arg2[%234, %235] : memref<2x96xi32, #tpu.memory_space<smem>>
      %c0_i32_130 = arith.constant 0 : i32
      %c0_i32_131 = arith.constant 0 : i32
      %237 = tpu.memref_slice %arg4[%236, %c0_i32_131] : memref<64x128xf32, #tpu.memory_space<any>> -> memref<1x128xf32, #tpu.memory_space<any>>
      %c0_i32_132 = arith.constant 0 : i32
      %c25_i32_133 = arith.constant 25 : i32
      %c0_i32_134 = arith.constant 0 : i32
      %238 = tpu.memref_slice %arg5[%c0_i32_132, %c25_i32_133, %c0_i32_134] : memref<1x32x128xf32, #tpu.memory_space<vmem>> -> memref<1x1x128xf32, #tpu.memory_space<vmem>>
      %239 = tpu.memref_squeeze %238 : memref<1x1x128xf32, #tpu.memory_space<vmem>> -> memref<1x128xf32, #tpu.memory_space<vmem>>
      %240 = tpu.memref_slice %arg6[%c0_i32_130] : memref<1x!tpu.dma_semaphore, #tpu.memory_space<semaphore_mem>> -> memref<1x!tpu.dma_semaphore, #tpu.memory_space<semaphore_mem>>
      %241 = tpu.memref_squeeze %240 : memref<1x!tpu.dma_semaphore, #tpu.memory_space<semaphore_mem>> -> memref<!tpu.dma_semaphore, #tpu.memory_space<semaphore_mem>>
      tpu.enqueue_dma source(%237 : memref<1x128xf32, #tpu.memory_space<any>>) target(%239 : memref<1x128xf32, #tpu.memory_space<vmem>>) target_semaphore(%241 : memref<!tpu.dma_semaphore, #tpu.memory_space<semaphore_mem>>)
      %c26_i32 = arith.constant 26 : i32
      %242 = arith.addi %0, %c26_i32 : i32
      %243 = arith.index_cast %arg0 : i32 to index
      %244 = arith.index_cast %242 : i32 to index
      %245 = memref.load %arg2[%243, %244] : memref<2x96xi32, #tpu.memory_space<smem>>
      %c0_i32_135 = arith.constant 0 : i32
      %c0_i32_136 = arith.constant 0 : i32
      %246 = tpu.memref_slice %arg4[%245, %c0_i32_136] : memref<64x128xf32, #tpu.memory_space<any>> -> memref<1x128xf32, #tpu.memory_space<any>>
      %c0_i32_137 = arith.constant 0 : i32
      %c26_i32_138 = arith.constant 26 : i32
      %c0_i32_139 = arith.constant 0 : i32
      %247 = tpu.memref_slice %arg5[%c0_i32_137, %c26_i32_138, %c0_i32_139] : memref<1x32x128xf32, #tpu.memory_space<vmem>> -> memref<1x1x128xf32, #tpu.memory_space<vmem>>
      %248 = tpu.memref_squeeze %247 : memref<1x1x128xf32, #tpu.memory_space<vmem>> -> memref<1x128xf32, #tpu.memory_space<vmem>>
      %249 = tpu.memref_slice %arg6[%c0_i32_135] : memref<1x!tpu.dma_semaphore, #tpu.memory_space<semaphore_mem>> -> memref<1x!tpu.dma_semaphore, #tpu.memory_space<semaphore_mem>>
      %250 = tpu.memref_squeeze %249 : memref<1x!tpu.dma_semaphore, #tpu.memory_space<semaphore_mem>> -> memref<!tpu.dma_semaphore, #tpu.memory_space<semaphore_mem>>
      tpu.enqueue_dma source(%246 : memref<1x128xf32, #tpu.memory_space<any>>) target(%248 : memref<1x128xf32, #tpu.memory_space<vmem>>) target_semaphore(%250 : memref<!tpu.dma_semaphore, #tpu.memory_space<semaphore_mem>>)
      %c27_i32 = arith.constant 27 : i32
      %251 = arith.addi %0, %c27_i32 : i32
      %252 = arith.index_cast %arg0 : i32 to index
      %253 = arith.index_cast %251 : i32 to index
      %254 = memref.load %arg2[%252, %253] : memref<2x96xi32, #tpu.memory_space<smem>>
      %c0_i32_140 = arith.constant 0 : i32
      %c0_i32_141 = arith.constant 0 : i32
      %255 = tpu.memref_slice %arg4[%254, %c0_i32_141] : memref<64x128xf32, #tpu.memory_space<any>> -> memref<1x128xf32, #tpu.memory_space<any>>
      %c0_i32_142 = arith.constant 0 : i32
      %c27_i32_143 = arith.constant 27 : i32
      %c0_i32_144 = arith.constant 0 : i32
      %256 = tpu.memref_slice %arg5[%c0_i32_142, %c27_i32_143, %c0_i32_144] : memref<1x32x128xf32, #tpu.memory_space<vmem>> -> memref<1x1x128xf32, #tpu.memory_space<vmem>>
      %257 = tpu.memref_squeeze %256 : memref<1x1x128xf32, #tpu.memory_space<vmem>> -> memref<1x128xf32, #tpu.memory_space<vmem>>
      %258 = tpu.memref_slice %arg6[%c0_i32_140] : memref<1x!tpu.dma_semaphore, #tpu.memory_space<semaphore_mem>> -> memref<1x!tpu.dma_semaphore, #tpu.memory_space<semaphore_mem>>
      %259 = tpu.memref_squeeze %258 : memref<1x!tpu.dma_semaphore, #tpu.memory_space<semaphore_mem>> -> memref<!tpu.dma_semaphore, #tpu.memory_space<semaphore_mem>>
      tpu.enqueue_dma source(%255 : memref<1x128xf32, #tpu.memory_space<any>>) target(%257 : memref<1x128xf32, #tpu.memory_space<vmem>>) target_semaphore(%259 : memref<!tpu.dma_semaphore, #tpu.memory_space<semaphore_mem>>)
      %c28_i32 = arith.constant 28 : i32
      %260 = arith.addi %0, %c28_i32 : i32
      %261 = arith.index_cast %arg0 : i32 to index
      %262 = arith.index_cast %260 : i32 to index
      %263 = memref.load %arg2[%261, %262] : memref<2x96xi32, #tpu.memory_space<smem>>
      %c0_i32_145 = arith.constant 0 : i32
      %c0_i32_146 = arith.constant 0 : i32
      %264 = tpu.memref_slice %arg4[%263, %c0_i32_146] : memref<64x128xf32, #tpu.memory_space<any>> -> memref<1x128xf32, #tpu.memory_space<any>>
      %c0_i32_147 = arith.constant 0 : i32
      %c28_i32_148 = arith.constant 28 : i32
      %c0_i32_149 = arith.constant 0 : i32
      %265 = tpu.memref_slice %arg5[%c0_i32_147, %c28_i32_148, %c0_i32_149] : memref<1x32x128xf32, #tpu.memory_space<vmem>> -> memref<1x1x128xf32, #tpu.memory_space<vmem>>
      %266 = tpu.memref_squeeze %265 : memref<1x1x128xf32, #tpu.memory_space<vmem>> -> memref<1x128xf32, #tpu.memory_space<vmem>>
      %267 = tpu.memref_slice %arg6[%c0_i32_145] : memref<1x!tpu.dma_semaphore, #tpu.memory_space<semaphore_mem>> -> memref<1x!tpu.dma_semaphore, #tpu.memory_space<semaphore_mem>>
      %268 = tpu.memref_squeeze %267 : memref<1x!tpu.dma_semaphore, #tpu.memory_space<semaphore_mem>> -> memref<!tpu.dma_semaphore, #tpu.memory_space<semaphore_mem>>
      tpu.enqueue_dma source(%264 : memref<1x128xf32, #tpu.memory_space<any>>) target(%266 : memref<1x128xf32, #tpu.memory_space<vmem>>) target_semaphore(%268 : memref<!tpu.dma_semaphore, #tpu.memory_space<semaphore_mem>>)
      %c29_i32 = arith.constant 29 : i32
      %269 = arith.addi %0, %c29_i32 : i32
      %270 = arith.index_cast %arg0 : i32 to index
      %271 = arith.index_cast %269 : i32 to index
      %272 = memref.load %arg2[%270, %271] : memref<2x96xi32, #tpu.memory_space<smem>>
      %c0_i32_150 = arith.constant 0 : i32
      %c0_i32_151 = arith.constant 0 : i32
      %273 = tpu.memref_slice %arg4[%272, %c0_i32_151] : memref<64x128xf32, #tpu.memory_space<any>> -> memref<1x128xf32, #tpu.memory_space<any>>
      %c0_i32_152 = arith.constant 0 : i32
      %c29_i32_153 = arith.constant 29 : i32
      %c0_i32_154 = arith.constant 0 : i32
      %274 = tpu.memref_slice %arg5[%c0_i32_152, %c29_i32_153, %c0_i32_154] : memref<1x32x128xf32, #tpu.memory_space<vmem>> -> memref<1x1x128xf32, #tpu.memory_space<vmem>>
      %275 = tpu.memref_squeeze %274 : memref<1x1x128xf32, #tpu.memory_space<vmem>> -> memref<1x128xf32, #tpu.memory_space<vmem>>
      %276 = tpu.memref_slice %arg6[%c0_i32_150] : memref<1x!tpu.dma_semaphore, #tpu.memory_space<semaphore_mem>> -> memref<1x!tpu.dma_semaphore, #tpu.memory_space<semaphore_mem>>
      %277 = tpu.memref_squeeze %276 : memref<1x!tpu.dma_semaphore, #tpu.memory_space<semaphore_mem>> -> memref<!tpu.dma_semaphore, #tpu.memory_space<semaphore_mem>>
      tpu.enqueue_dma source(%273 : memref<1x128xf32, #tpu.memory_space<any>>) target(%275 : memref<1x128xf32, #tpu.memory_space<vmem>>) target_semaphore(%277 : memref<!tpu.dma_semaphore, #tpu.memory_space<semaphore_mem>>)
      %c30_i32 = arith.constant 30 : i32
      %278 = arith.addi %0, %c30_i32 : i32
      %279 = arith.index_cast %arg0 : i32 to index
      %280 = arith.index_cast %278 : i32 to index
      %281 = memref.load %arg2[%279, %280] : memref<2x96xi32, #tpu.memory_space<smem>>
      %c0_i32_155 = arith.constant 0 : i32
      %c0_i32_156 = arith.constant 0 : i32
      %282 = tpu.memref_slice %arg4[%281, %c0_i32_156] : memref<64x128xf32, #tpu.memory_space<any>> -> memref<1x128xf32, #tpu.memory_space<any>>
      %c0_i32_157 = arith.constant 0 : i32
      %c30_i32_158 = arith.constant 30 : i32
      %c0_i32_159 = arith.constant 0 : i32
      %283 = tpu.memref_slice %arg5[%c0_i32_157, %c30_i32_158, %c0_i32_159] : memref<1x32x128xf32, #tpu.memory_space<vmem>> -> memref<1x1x128xf32, #tpu.memory_space<vmem>>
      %284 = tpu.memref_squeeze %283 : memref<1x1x128xf32, #tpu.memory_space<vmem>> -> memref<1x128xf32, #tpu.memory_space<vmem>>
      %285 = tpu.memref_slice %arg6[%c0_i32_155] : memref<1x!tpu.dma_semaphore, #tpu.memory_space<semaphore_mem>> -> memref<1x!tpu.dma_semaphore, #tpu.memory_space<semaphore_mem>>
      %286 = tpu.memref_squeeze %285 : memref<1x!tpu.dma_semaphore, #tpu.memory_space<semaphore_mem>> -> memref<!tpu.dma_semaphore, #tpu.memory_space<semaphore_mem>>
      tpu.enqueue_dma source(%282 : memref<1x128xf32, #tpu.memory_space<any>>) target(%284 : memref<1x128xf32, #tpu.memory_space<vmem>>) target_semaphore(%286 : memref<!tpu.dma_semaphore, #tpu.memory_space<semaphore_mem>>)
      %c31_i32 = arith.constant 31 : i32
      %287 = arith.addi %0, %c31_i32 : i32
      %288 = arith.index_cast %arg0 : i32 to index
      %289 = arith.index_cast %287 : i32 to index
      %290 = memref.load %arg2[%288, %289] : memref<2x96xi32, #tpu.memory_space<smem>>
      %c0_i32_160 = arith.constant 0 : i32
      %c0_i32_161 = arith.constant 0 : i32
      %291 = tpu.memref_slice %arg4[%290, %c0_i32_161] : memref<64x128xf32, #tpu.memory_space<any>> -> memref<1x128xf32, #tpu.memory_space<any>>
      %c0_i32_162 = arith.constant 0 : i32
      %c31_i32_163 = arith.constant 31 : i32
      %c0_i32_164 = arith.constant 0 : i32
      %292 = tpu.memref_slice %arg5[%c0_i32_162, %c31_i32_163, %c0_i32_164] : memref<1x32x128xf32, #tpu.memory_space<vmem>> -> memref<1x1x128xf32, #tpu.memory_space<vmem>>
      %293 = tpu.memref_squeeze %292 : memref<1x1x128xf32, #tpu.memory_space<vmem>> -> memref<1x128xf32, #tpu.memory_space<vmem>>
      %294 = tpu.memref_slice %arg6[%c0_i32_160] : memref<1x!tpu.dma_semaphore, #tpu.memory_space<semaphore_mem>> -> memref<1x!tpu.dma_semaphore, #tpu.memory_space<semaphore_mem>>
      %295 = tpu.memref_squeeze %294 : memref<1x!tpu.dma_semaphore, #tpu.memory_space<semaphore_mem>> -> memref<!tpu.dma_semaphore, #tpu.memory_space<semaphore_mem>>
      tpu.enqueue_dma source(%291 : memref<1x128xf32, #tpu.memory_space<any>>) target(%293 : memref<1x128xf32, #tpu.memory_space<vmem>>) target_semaphore(%295 : memref<!tpu.dma_semaphore, #tpu.memory_space<semaphore_mem>>)
      %c0_i32_165 = arith.constant 0 : i32
      %296 = tpu.memref_slice %arg6[%c0_i32_165] : memref<1x!tpu.dma_semaphore, #tpu.memory_space<semaphore_mem>> -> memref<1x!tpu.dma_semaphore, #tpu.memory_space<semaphore_mem>>
      %297 = tpu.memref_squeeze %296 : memref<1x!tpu.dma_semaphore, #tpu.memory_space<semaphore_mem>> -> memref<!tpu.dma_semaphore, #tpu.memory_space<semaphore_mem>>
      tpu.wait_dma2 semaphore(%297 : memref<!tpu.dma_semaphore, #tpu.memory_space<semaphore_mem>>) src(%arg5 : memref<1x32x128xf32, #tpu.memory_space<vmem>>) dst(%arg5 : memref<1x32x128xf32, #tpu.memory_space<vmem>>)
    } else {
    }
    %c20_i32_1 = arith.constant 20 : i32
    %5 = arith.cmpi slt, %0, %c20_i32_1 : i32
    %6 = arith.extui %5 : i1 to i32
    %c0_i32_2 = arith.constant 0 : i32
    %7 = arith.cmpi ne, %6, %c0_i32_2 : i32
    scf.if %7 {
      %8 = tpu.assume_multiple %0, 32 : i32
      %9 = arith.index_cast %8 : i32 to index
      %c0 = arith.constant 0 : index
      %10 = vector.load %arg3[%9, %c0] : memref<32x128xf32, #tpu.memory_space<vmem>>, vector<32x128xf32>
      %11 = tpu.iota {dimensions = array<i32: 0>} : vector<32x1xi32>
      %12 = vector.broadcast %0 : i32 to vector<32x1xi32>
      %13 = arith.addi %12, %11 : vector<32x1xi32>
      %c20_i32_3 = arith.constant 20 : i32
      %14 = vector.broadcast %c20_i32_3 : i32 to vector<32x1xi32>
      %15 = arith.cmpi slt, %13, %14 : vector<32x1xi32>
      %c0_4 = arith.constant 0 : index
      %c0_5 = arith.constant 0 : index
      %c0_6 = arith.constant 0 : index
      %16 = vector.load %arg5[%c0_4, %c0_5, %c0_6] : memref<1x32x128xf32, #tpu.memory_space<vmem>>, vector<1x32x128xf32>
      %17 = vector.shape_cast %16 : vector<1x32x128xf32> to vector<32x128xf32>
      %18 = vector.shape_cast %15 : vector<32x1xi1> to vector<32x1xi1>
      %19 = vector.broadcast %18 : vector<32x1xi1> to vector<32x128xi1>
      %20 = arith.select %19, %10, %17 : vector<32x128xi1>, vector<32x128xf32>
      %c0_7 = arith.constant 0 : index
      %c0_8 = arith.constant 0 : index
      %c0_9 = arith.constant 0 : index
      %21 = vector.load %arg5[%c0_7, %c0_8, %c0_9] : memref<1x32x128xf32, #tpu.memory_space<vmem>>, vector<1x32x128xf32>
      %22 = vector.shape_cast %21 : vector<1x32x128xf32> to vector<32x128xf32>
      %23 = vector.shape_cast %20 : vector<32x128xf32> to vector<1x32x128xf32>
      tpu.vector_store %arg5[%c0_7, %c0_8, %c0_9], %23 {strides = array<i32>} : memref<1x32x128xf32, #tpu.memory_space<vmem>>, vector<1x32x128xf32>,
    } else {
    }
    return
  }
  func.func @transform_0(%arg0: i32, %arg1: i32, %arg2: memref<2x96xi32, #tpu.memory_space<smem>>) -> (i32, i32) {
    %c0_i32 = arith.constant 0 : i32
    %c0_i32_0 = arith.constant 0 : i32
    %c0_i32_1 = arith.constant 0 : i32
    return %c0_i32, %c0_i32_0 : i32, i32
  }
  func.func @transform_2(%arg0: i32, %arg1: i32, %arg2: memref<2x96xi32, #tpu.memory_space<smem>>) -> (i32, i32, i32) {
    %c0_i32 = arith.constant 0 : i32
    %c0_i32_0 = arith.constant 0 : i32
    return %arg0, %arg1, %c0_i32 : i32, i32, i32
  }
}

</mosaic_0001>

<bundles_post_ra>
// kernel: tpu_custom_call.1
= control target key start
LH: loop header
LB: loop body
LE: loop exit
PB: predicated region body
PF: predicated region fallthrough
CT: control target
= control target key end

     0   :  { %s3114_s0 = inlined_call_operand.hbm [shape: s32[2,96], index: 0, kind: input, shape index: {}]   ;;  %s3115_s1 = inlined_call_operand.hbm [shape: f32[32,128], index: 1, kind: input, shape index: {}]   ;;  %s3116_s2 = inlined_call_operand.hbm [shape: f32[64,128], index: 2, kind: input, shape index: {}]   ;;  %s3117_s3 = inlined_call_operand.vmem [shape: f32[2,65,128], index: 3, kind: output, shape index: {}]  }
   0x1   :  { %3125 = sst [smem:[#allocation81_spill]] %s3115_s1  ;;  %s1462_s14 = scalar_lea.hbm %s3114_s0, 32 }
   0x2   :  { %p1463_p0 = scmp.ne.s32.totalorder %s3114_s0, %s1462_s14  ;;  %p1466_p1 = scmp.lt.u32.totalorder %s1462_s14, %s3114_s0 }
   0x4   :  { %p1468_p2 = pnand %p1466_p1, %p1463_p0 }
   0x6   :  { %1471 = shalt.err (!%p1468_p2)  }
   0x7   :  { %s2396_s19 = smov [#allocation4]  }
   0x8   :  { %9 = dma.hbm_to_smem %s3114_s0, 32, %s2396_s19, [#allocation3] }
   0x9   :  { %2328 = dma.done.wait [#allocation3], 32 }
   0xa   :  { %2329 = vsyncadd [#allocation3], 4294967264 }
   0xb   :  { %11 = sfence }
   0xc   :  { %12 = vsyncpa [#allocation6], 0  ;;  %s2433_s22 = smov 0   ;;  %s2435_s23 = smov 0  }
   0xd   :  { %s2437_s24 = smov 0   ;;  %s2439_s25 = smov 0  }
   0xe   :  { %s2441_s26 = smov 0   ;;  %s2443_s27 = smov 0  }
   0xf   :  { %s2445_s28 = smov 0  }
  0x10 LB: > { %3126 = sst [smem:[#allocation77_spill]] %s2354_s26  ;;  %s1233_s0 = sadd.s32 4294967295, %s2362_s28   ;;  %s2362_s28 = sphi %s2445_s28, %s18_s28   ;;  %s2358_s27 = sphi %s2443_s27, %s3145_s27   ;;  %s2354_s26 = sphi %s2441_s26, %s3144_s26   ;;  %s2350_s25 = sphi %s2439_s25, %s3143_s25   ;;  %s2346_s24 = sphi %s2437_s24, %s3142_s24   ;;  %s2342_s23 = sphi %s2435_s23, %s3147_s23   ;;  %s2338_s22 = sphi %s2433_s22, %s3146_s22  }
  0x11   : > { %3127 = sst [smem:[#allocation78_spill]] %s2358_s27  ;;  %s27_s29 = sadd.s32 1, %s2354_s26 }
  0x12   : > { %p28_p3 = scmp.ge.s32.totalorder %s27_s29, 3  ;;  %s30_s30 = sadd.s32 1, %s2358_s27 }
  0x13   : > { %s60_s4 = sadd.s32 1, %s2342_s23  ;;  %p70_p4 = scmp.ne.s32.totalorder %s2342_s23, %s2338_s22 }
  0x14   : > { %s3149_s29 = smov (%p28_p3, %s27_s29), 0  ;;  %s3151_s30 = smov (!%p28_p3, %s30_s30), %s2358_s27 }
  0x15   : > { %3128 = sst [smem:[#allocation79_spill]] %s3149_s29  ;;  %s56_s5 = ssub.s32 %s2354_s26, %s3149_s29 }
  0x16   : > { %p71_p5 = scmp.eq.s32.totalorder %s1233_s0, 5  ;;  %p32_p6 = scmp.ge.s32.totalorder %s3151_s30, 2 }
  0x17   : > { %p1235_p7 = scmp.ge.s32.totalorder %s2362_s28, 1  ;;  %p84_p9 = scmp.lt.s32.totalorder %s2362_s28, 7 }
  0x18   : > { %p2480_p8 = por %p71_p5, %p70_p4  ;;  %s3153_s30 = smov (%p32_p6, %s3151_s30), 0 }
  0x19   : > { %3130 = sst [smem:[#allocation80_spill]] %s3153_s30  ;;  %p2487_p10 = pnand %p1235_p7, %p84_p9 }
  0x1a   : > { %s3129_s6 = scalar_select %p2480_p8, 1, 0 }
  0x1b   : > { %s3131_s7 = scalar_select %p2487_p10, 1, 0 }
  0x1c   : > { %s55_s8 = ssub.s32 %s2358_s27, %s3153_s30  ;;  %p2493_p11 = scmp.eq.s32.totalorder %s1233_s0, 0 }
  0x1d   : > { %s57_s10 = sor.u32 %s56_s5, %s55_s8  ;;  %p1332_p12 = pneg %p2487_p10 }
  0x1e   : > { %s3132_s9 = scalar_select %p2493_p11, 1, 0 }
  0x1f   : > { %p58_p13 = scmp.eq.s32.totalorder %s57_s10, 0  ;;  %s2397_s11 = smov [#allocation5]  }
  0x20   : > { %s96_s12 = sshll.u32 %s2397_s11, 4  ;;  %p2501_p0 = pnand %p2493_p11, %p1332_p12  ;;  %s97_s12 = int_to_ptr.vmem [resolvable:$true] %s96_s12 }
  0x21   : > { %s2506_s14 = scalar_select %p58_p13, %s2342_s23, %s60_s4  }
  0x22   : > { %s3134_s1 = sld [smem:[#allocation81_spill]]  ;;  %p1474_p2 = pneg %p2501_p0 }
  0x28   : > { %s1472_s17 = scalar_lea.hbm %s3134_s1, 512 }
  0x29   : > { %p1473_p1 = scmp.ne.s32.totalorder %s3134_s1, %s1472_s17  ;;  %p1479_p5 = scmp.lt.u32.totalorder %s1472_s17, %s3134_s1 }
  0x2b   : > { %p1475_p3 = pnand %p1474_p2, %p1473_p1 }
  0x2d   : > { %p1476_p4 = pneg %p1475_p3 }
  0x2f   : > { %p1481_p6 = pnand %p1479_p5, %p1476_p4 }
  0x31   : > { %1484 = shalt.err (!%p1481_p6)
}
  0x32   : > { %s1485_s0 = scalar_lea.vmem %s97_s12, 512  ;;  %p1493_p13 = scmp.lt.s32.totalorder %s97_s12, %s97_s12 }
  0x33   : > { %p1486_p7 = scmp.ne.s32.totalorder %s97_s12, %s1485_s0  ;;  %p1494_p8 = scmp.lt.s32.totalorder %s1485_s0, %s1485_s0 }
  0x35   : > { %p1488_p9 = pnand %p1486_p7, %p1474_p2  ;;  %p1495_p11 = por %p1494_p8, %p1493_p13 }
  0x37   : > { %p1489_p12 = pneg %p1488_p9 }
  0x39   : > { %p1496_p10 = pnand %p1495_p11, %p1489_p12 }
  0x3b   : > { %1499 = shalt.err (!%p1496_p10)
}
  0x3c   : > { %s2398_s4 = smov 128   ;;  %s2399_s5 = smov 8  }
  0x3d   : > { %1335 = dma.hbm_to_vmem [thread:$0]  (!%p2501_p0), %s3134_s1, 512, %s97_s12, [#allocation6], %s2398_s4, %s2398_s4, %s2399_s5  }
  0x3e   : > { %p3135_p1 = scmp.ne.s32.totalorder %s3131_s7, 0 }
  0x3f   : > { %p3136_p3 = scmp.ne.s32.totalorder (!%p3135_p1), %s3132_s9, 0 }
  0x40   : > { %112 = sbr.rel (%p3135_p1) target bundleno = 949 (0x3b5), region = 24 }
  0x47   : > { %2331 = dma.done.wait (%p3136_p3), [#allocation6], 512  }
  0x48   : > { %2333 = vsyncadd (%p3136_p3), [#allocation6], 4294966784  ;;  %s123_s11 = sand.u32 1, %s2338_s22   ;;  %s2532_s15 = sshll.u32 %s2346_s24, 5 }
  0x49   : > { %s1239_s13 = sshll.u32 %s123_s11, 5  ;;  %s132_s16 = sadd.s32 32, %s2532_s15 }
  0x4a   : > { %s2535_s17 = scalar_lea.vmem [#allocation7], %s1239_s13   ;;  %p1241_p8 = scmp.le.s32.totalorder %s132_s16, 20 }
  0x4b   : > { %s137_s7 = sshra.s32 (!%p1241_p8), %s2532_s15, 7  ;;  %s142_s9 = sand.u32 (!%p1241_p8), 127, %s2532_s15 }
  0x4c   : > { %136 = sbr.rel (%p1241_p8) target bundleno = 878 (0x36e), region = 32  ;;  %s139_s12 = sadd.s32 (!%p1241_p8), %s2350_s25, %s137_s7 }
  0x4d   : > { %s154_s22 = sshll.u32 (!%p1241_p8), %s2535_s17, 4  ;;  %s1242_s18 = sshll.u32 (!%p1241_p8), %s139_s12, 7  ;;  %s2541_s22 = int_to_ptr.vmem [resolvable:$true] %s154_s22 }
  0x4e   : > { %s143_s19 = sadd.s32 (!%p1241_p8), %s1242_s18, %s142_s9  ;;  %s158_s20 = sadd.s32 (!%p1241_p8), 1, %s2532_s15 }
  0x4f   : > { %s144_s21 = sld [smem:[#allocation4 + %s143_s19]] (!%p1241_p8)  ;;  %s159_s0 = sshra.s32 (!%p1241_p8), %s158_s20, 7 }
  0x50   : > { %s161_s4 = sadd.s32 (!%p1241_p8), %s2350_s25, %s159_s0  ;;  %s164_s5 = sand.u32 (!%p1241_p8), 127, %s158_s20 }
  0x51   : > { %s1244_s8 = sshll.u32 (!%p1241_p8), %s161_s4, 7  ;;  %s169_s10 = scalar_lea.vmem (!%p1241_p8), %s2535_s17, 1 [#allocation7] }
  0x52   : > { %s165_s11 = sadd.s32 (!%p1241_p8), %s1244_s8, %s164_s5  ;;  %s177_s13 = sshll.u32 (!%p1241_p8), %s169_s10, 4  ;;  %s2548_s13 = int_to_ptr.vmem [resolvable:$true] %s177_s13 }
  0x53   : > { %s2546_s16 = sld [smem:[#allocation4 + %s165_s11]]  ;;  %s181_s7 = sadd.s32 2, %s2532_s15 }
  0x54   : > { %s182_s30 = sshra.s32 %s181_s7, 7  ;;  %s2559_s4 = scalar_lea.hbm %s3116_s2, 1024 }
  0x55   : > { %s1243_s12 = sshll.u32 %s144_s21, 4  ;;  %s184_s19 = sadd.s32 %s2350_s25, %s182_s30 }
  0x56   : > { %s146_s18 = scalar_lea.hbm %s3116_s2, %s1243_s12 }
  0x57   : > { %s1500_s27 = scalar_lea.hbm %s146_s18, 16  ;;  %p1503_p11 = scmp.lt.u32.totalorder %s146_s18, %s3116_s2 }
  0x58   : > { %p1501_p10 = scmp.ne.s32.totalorder %s146_s18, %s1500_s27  ;;  %p1504_p0 = scmp.lt.u32.totalorder %s2559_s4, %s1500_s27 }
  0x59   : > { %p1506_p4 = scmp.lt.u32.totalorder %s1500_s27, %s146_s18 }
  0x5a   : > { %p1505_p2 = por %p1504_p0, %p1503_p11 }
  0x5c   : > { %p1507_p5 = por %p1506_p4, %p1505_p2 }
  0x5e   : > { %p1508_p6 = pnand %p1507_p5, %p1501_p10 }
  0x60   : > { %1511 = shalt.err (!%p1508_p6)  }
  0x61   : > { %s1512_s29 = scalar_lea.vmem %s2541_s22, 16  ;;  %s2400_s30 = smov [#allocation7]  }
  0x62   : > { %p1513_p7 = scmp.ne.s32.totalorder %s2541_s22, %s1512_s29  ;;  %s1514_s21 = sshll.u32 %s2400_s30, 4  ;;  %s2567_s21 = int_to_ptr.vmem [resolvable:$false] %s1514_s21 }
  0x63   : > { %s2570_s10 = scalar_lea.vmem %s2567_s21, 1024  ;;  %p1517_p9 = scmp.lt.s32.totalorder %s2541_s22, %s2567_s21 }
  0x64   : > { %p1518_p12 = scmp.lt.s32.totalorder %s2570_s10, %s1512_s29 }
  0x66   : > { %p1519_p13 = por %p1518_p12, %p1517_p9 }
  0x68   : > { %p1520_p1 = pnand %p1519_p13, %p1513_p7 }
  0x6a   : > { %1523 = shalt.err (!%p1520_p1)  }
  0x6b   : > { %157 = dma.hbm_to_vmem [thread:$0]  %s146_s18, 16, %s2541_s22, [#allocation2] }
  0x6c   : > { %s1246_s27 = sshll.u32 %s184_s19, 7  ;;  %s187_s11 = sand.u32 127, %s181_s7 }
  0x6d   : > { %s1245_s12 = sshll.u32 %s2546_s16, 4  ;;  %s188_s9 = sadd.s32 %s1246_s27, %s187_s11 }
  0x6e   : > { %s168_s5 = scalar_lea.hbm %s3116_s2, %s1245_s12  ;;  %s2580_s8 = sld [smem:[#allocation4 + %s188_s9]] }
  0x6f   : > { %s1524_s30 = scalar_lea.hbm %s168_s5, 16  ;;  %p1527_p8 = scmp.lt.u32.totalorder %s168_s5, %s3116_s2 }
  0x70   : > { %p1525_p3 = scmp.ne.s32.totalorder %s168_s5, %s1524_s30  ;;  %p1528_p10 = scmp.lt.u32.totalorder %s2559_s4, %s1524_s30 }
  0x71   : > { %p1530_p0 = scmp.lt.u32.totalorder %s1524_s30, %s168_s5 }
  0x72   : > { %p1529_p11 = por %p1528_p10, %p1527_p8 }
  0x74   : > { %p1531_p2 = por %p1530_p0, %p1529_p11 }
  0x76   : > { %p1532_p4 = pnand %p1531_p2, %p1525_p3 }
  0x78   : > { %1535 = shalt.err (!%p1532_p4)  }
  0x79   : > { %s1536_s22 = scalar_lea.vmem %s2548_s13, 16  ;;  %p1541_p6 = scmp.lt.s32.totalorder %s2548_s13, %s2567_s21 }
  0x7a   : > { %p1537_p5 = scmp.ne.s32.totalorder %s2548_s13, %s1536_s22  ;;  %p1542_p7 = scmp.lt.s32.totalorder %s2570_s10, %s1536_s22 }
  0x7c   : > { %p1543_p9 = por %p1542_p7, %p1541_p6 }
  0x7e   : > { %p1544_p12 = pnand %p1543_p9, %p1537_p5 }
  0x80   : > { %1547 = shalt.err (!%p1544_p12)  }
  0x81   : > { %180 = dma.hbm_to_vmem [thread:$0]  %s168_s5, 16, %s2548_s13, [#allocation2] }
  0x82   : > { %s3137_s1 = scalar_lea.vmem %s2535_s17, 2 [#allocation7]  ;;  %s204_s7 = sadd.s32 3, %s2532_s15 }
  0x83   : > { %s200_s16 = sshll.u32 %s3137_s1, 4  ;;  %s205_s18 = sshra.s32 %s204_s7, 7  ;;  %s201_s16 = int_to_ptr.vmem [resolvable:$true] %s200_s16 }
  0x84   : > { %s207_s19 = sadd.s32 %s2350_s25, %s205_s18  ;;  %s210_s27 = sand.u32 127, %s204_s7 }
  0x85   : > { %s1248_s11 = sshll.u32 %s207_s19, 7  ;;  %s215_s12 = scalar_lea.vmem %s2535_s17, 3 [#allocation7] }
  0x86   : > { %s1247_s9 = sshll.u32 %s2580_s8, 4  ;;  %s211_s20 = sadd.s32 %s1248_s11, %s210_s27 }
  0x87   : > { %s191_s29 = scalar_lea.hbm %s3116_s2, %s1247_s9  ;;  %s2601_s22 = sld [smem:[#allocation4 + %s211_s20]] }
  0x88   : > { %s1548_s26 = scalar_lea.hbm %s191_s29, 16  ;;  %p1551_p1 = scmp.lt.u32.totalorder %s191_s29, %s3116_s2 }
  0x89   : > { %p1549_p13 = scmp.ne.s32.totalorder %s191_s29, %s1548_s26  ;;  %p1552_p3 = scmp.lt.u32.totalorder %s2559_s4, %s1548_s26 }
  0x8a   : > { %p1554_p10 = scmp.lt.u32.totalorder %s1548_s26, %s191_s29 }
  0x8b   : > { %p1553_p8 = por %p1552_p3, %p1551_p1 }
  0x8d   : > { %p1555_p11 = por %p1554_p10, %p1553_p8 }
  0x8f   : > { %p1556_p0 = pnand %p1555_p11, %p1549_p13 }
  0x91   : > { %1559 = shalt.err (!%p1556_p0)  }
  0x92   : > { %s1560_s8 = scalar_lea.vmem %s201_s16, 16  ;;  %p1565_p4 = scmp.lt.s32.totalorder %s201_s16, %s2567_s21 }
  0x93   : > { %p1561_p2 = scmp.ne.s32.totalorder %s201_s16, %s1560_s8  ;;  %p1566_p5 = scmp.lt.s32.totalorder %s2570_s10, %s1560_s8 }
  0x95   : > { %p1567_p6 = por %p1566_p5, %p1565_p4 }
  0x97   : > { %p1568_p7 = pnand %p1567_p6, %p1561_p2 }
  0x99   : > { %1571 = shalt.err (!%p1568_p7)  }
  0x9a   : > { %203 = dma.hbm_to_vmem [thread:$0]  %s191_s29, 16, %s201_s16, [#allocation2] }
  0x9b   : > { %s223_s1 = sshll.u32 %s215_s12, 4  ;;  %s227_s26 = sadd.s32 4, %s2532_s15  ;;  %s224_s1 = int_to_ptr.vmem [resolvable:$true] %s223_s1 }
  0x9c   : > { %s228_s7 = sshra.s32 %s227_s26, 7  ;;  %s233_s19 = sand.u32 127, %s227_s26 }
  0x9d   : > { %s230_s18 = sadd.s32 %s2350_s25, %s228_s7  ;;  %s238_s11 = scalar_lea.vmem %s2535_s17, 4 [#allocation7] }
  0x9e   : > { %s1250_s27 = sshll.u32 %s230_s18, 7  ;;  %s1249_s9 = sshll.u32 %s2601_s22, 4 }
  0x9f   : > { %s234_s20 = sadd.s32 %s1250_s27, %s233_s19  ;;  %s214_s13 = scalar_lea.hbm %s3116_s2, %s1249_s9 }
  0xa0   : > { %s2616_s16 = sld [smem:[#allocation4 + %s234_s20]]  ;;  %s1572_s29 = scalar_lea.hbm %s214_s13, 16 }
  0xa1   : > { %p1573_p9 = scmp.ne.s32.totalorder %s214_s13, %s1572_s29  ;;  %p1575_p12 = scmp.lt.u32.totalorder %s214_s13, %s3116_s2 }
  0xa2   : > { %p1576_p13 = scmp.lt.u32.totalorder %s2559_s4, %s1572_s29  ;;  %p1578_p3 = scmp.lt.u32.totalorder %s1572_s29, %s214_s13 }
  0xa4   : > { %p1577_p1 = por %p1576_p13, %p1575_p12 }
  0xa6   : > { %p1579_p8 = por %p1578_p3, %p1577_p1 }
  0xa8   : > { %p1580_p10 = pnand %p1579_p8, %p1573_p9 }
  0xaa   : > { %1583 = shalt.err (!%p1580_p10)  }
  0xab   : > { %s1584_s12 = scalar_lea.vmem %s224_s1, 16  ;;  %p1589_p0 = scmp.lt.s32.totalorder %s224_s1, %s2567_s21 }
  0xac   : > { %p1585_p11 = scmp.ne.s32.totalorder %s224_s1, %s1584_s12  ;;  %p1590_p2 = scmp.lt.s32.totalorder %s2570_s10, %s1584_s12 }
  0xae   : > { %p1591_p4 = por %p1590_p2, %p1589_p0 }
  0xb0   : > { %p1592_p5 = pnand %p1591_p4, %p1585_p11 }
  0xb2   : > { %1595 = shalt.err (!%p1592_p5)  }
  0xb3   : > { %226 = dma.hbm_to_vmem [thread:$0]  %s214_s13, 16, %s224_s1, [#allocation2] }
  0xb4   : > { %s246_s22 = sshll.u32 %s238_s11, 4  ;;  %s250_s26 = sadd.s32 5, %s2532_s15  ;;  %s247_s22 = int_to_ptr.vmem [resolvable:$true] %s246_s22 }
  0xb5   : > { %s251_s7 = sshra.s32 %s250_s26, 7  ;;  %s256_s19 = sand.u32 127, %s250_s26 }
  0xb6   : > { %s253_s18 = sadd.s32 %s2350_s25, %s251_s7  ;;  %s261_s9 = scalar_lea.vmem %s2535_s17, 5 [#allocation7] }
  0xb7   : > { %s1252_s27 = sshll.u32 %s253_s18, 7  ;;  %s1251_s20 = sshll.u32 %s2616_s16, 4 }
  0xb8   : > { %s257_s0 = sadd.s32 %s1252_s27, %s256_s19  ;;  %s237_s5 = scalar_lea.hbm %s3116_s2, %s1251_s20 }
  0xb9   : > { %s2631_s1 = sld [smem:[#allocation4 + %s257_s0]]  ;;  %s1596_s13 = scalar_lea.hbm %s237_s5, 16 }
  0xba   : > { %p1597_p6 = scmp.ne.s32.totalorder %s237_s5, %s1596_s13  ;;  %p1599_p7 = scmp.lt.u32.totalorder %s237_s5, %s3116_s2 }
  0xbb   : > { %p1600_p9 = scmp.lt.u32.totalorder %s2559_s4, %s1596_s13  ;;  %p1602_p13 = scmp.lt.u32.totalorder %s1596_s13, %s237_s5 }
  0xbd   : > { %p1601_p12 = por %p1600_p9, %p1599_p7 }
  0xbf   : > { %p1603_p1 = por %p1602_p13, %p1601_p12 }
  0xc1   : > { %p1604_p3 = pnand %p1603_p1, %p1597_p6 }
  0xc3   : > { %1607 = shalt.err (!%p1604_p3)  }
  0xc4   : > { %s1608_s11 = scalar_lea.vmem %s247_s22, 16  ;;  %p1613_p10 = scmp.lt.s32.totalorder %s247_s22, %s2567_s21 }
  0xc5   : > { %p1609_p8 = scmp.ne.s32.totalorder %s247_s22, %s1608_s11  ;;  %p1614_p11 = scmp.lt.s32.totalorder %s2570_s10, %s1608_s11 }
  0xc7   : > { %p1615_p0 = por %p1614_p11, %p1613_p10 }
  0xc9   : > { %p1616_p2 = pnand %p1615_p0, %p1609_p8 }
  0xcb   : > { %1619 = shalt.err (!%p1616_p2)  }
  0xcc   : > { %249 = dma.hbm_to_vmem [thread:$0]  %s237_s5, 16, %s247_s22, [#allocation2] }
  0xcd   : > { %s269_s16 = sshll.u32 %s261_s9, 4  ;;  %s273_s26 = sadd.s32 6, %s2532_s15  ;;  %s270_s16 = int_to_ptr.vmem [resolvable:$true] %s269_s16 }
  0xce   : > { %s274_s7 = sshra.s32 %s273_s26, 7  ;;  %s279_s19 = sand.u32 127, %s273_s26 }
  0xcf   : > { %s276_s18 = sadd.s32 %s2350_s25, %s274_s7  ;;  %s284_s20 = scalar_lea.vmem %s2535_s17, 6 [#allocation7] }
  0xd0   : > { %s1254_s27 = sshll.u32 %s276_s18, 7  ;;  %s1253_s0 = sshll.u32 %s2631_s1, 4 }
  0xd1   : > { %s280_s30 = sadd.s32 %s1254_s27, %s279_s19  ;;  %s260_s8 = scalar_lea.hbm %s3116_s2, %s1253_s0 }
  0xd2   : > { %s2646_s22 = sld [smem:[#allocation4 + %s280_s30]]  ;;  %s1620_s5 = scalar_lea.hbm %s260_s8, 16 }
  0xd3   : > { %p1621_p4 = scmp.ne.s32.totalorder %s260_s8, %s1620_s5  ;;  %p1623_p5 = scmp.lt.u32.totalorder %s260_s8, %s3116_s2 }
  0xd4   : > { %p1624_p6 = scmp.lt.u32.totalorder %s2559_s4, %s1620_s5  ;;  %p1626_p9 = scmp.lt.u32.totalorder %s1620_s5, %s260_s8 }
  0xd6   : > { %p1625_p7 = por %p1624_p6, %p1623_p5 }
  0xd8   : > { %p1627_p12 = por %p1626_p9, %p1625_p7 }
  0xda   : > { %p1628_p13 = pnand %p1627_p12, %p1621_p4 }
  0xdc   : > { %1631 = shalt.err (!%p1628_p13)  }
  0xdd   : > { %s1632_s9 = scalar_lea.vmem %s270_s16, 16  ;;  %p1637_p3 = scmp.lt.s32.totalorder %s270_s16, %s2567_s21 }
  0xde   : > { %p1633_p1 = scmp.ne.s32.totalorder %s270_s16, %s1632_s9  ;;  %p1638_p8 = scmp.lt.s32.totalorder %s2570_s10, %s1632_s9 }
  0xe0   : > { %p1639_p10 = por %p1638_p8, %p1637_p3 }
  0xe2   : > { %p1640_p11 = pnand %p1639_p10, %p1633_p1 }
  0xe4   : > { %1643 = shalt.err (!%p1640_p11)  }
  0xe5   : > { %272 = dma.hbm_to_vmem [thread:$0]  %s260_s8, 16, %s270_s16, [#allocation2] }
  0xe6   : > { %s292_s1 = sshll.u32 %s284_s20, 4  ;;  %s296_s26 = sadd.s32 7, %s2532_s15  ;;  %s293_s1 = int_to_ptr.vmem [resolvable:$true] %s292_s1 }
  0xe7   : > { %s297_s7 = sshra.s32 %s296_s26, 7  ;;  %s302_s19 = sand.u32 127, %s296_s26 }
  0xe8   : > { %s299_s18 = sadd.s32 %s2350_s25, %s297_s7  ;;  %s307_s0 = scalar_lea.vmem %s2535_s17, 7 [#allocation7] }
  0xe9   : > { %s1256_s27 = sshll.u32 %s299_s18, 7  ;;  %s1255_s30 = sshll.u32 %s2646_s22, 4 }
  0xea   : > { %s303_s29 = sadd.s32 %s1256_s27, %s302_s19  ;;  %s283_s12 = scalar_lea.hbm %s3116_s2, %s1255_s30 }
  0xeb   : > { %s2661_s16 = sld [smem:[#allocation4 + %s303_s29]]  ;;  %s1644_s8 = scalar_lea.hbm %s283_s12, 16 }
  0xec   : > { %p1645_p0 = scmp.ne.s32.totalorder %s283_s12, %s1644_s8  ;;  %p1647_p2 = scmp.lt.u32.totalorder %s283_s12, %s3116_s2 }
  0xed   : > { %p1648_p4 = scmp.lt.u32.totalorder %s2559_s4, %s1644_s8  ;;  %p1650_p6 = scmp.lt.u32.totalorder %s1644_s8, %s283_s12 }
  0xef   : > { %p1649_p5 = por %p1648_p4, %p1647_p2 }
  0xf1   : > { %p1651_p7 = por %p1650_p6, %p1649_p5 }
  0xf3   : > { %p1652_p9 = pnand %p1651_p7, %p1645_p0 }
  0xf5   : > { %1655 = shalt.err (!%p1652_p9)  }
  0xf6   : > { %s1656_s20 = scalar_lea.vmem %s293_s1, 16  ;;  %p1661_p13 = scmp.lt.s32.totalorder %s293_s1, %s2567_s21 }
  0xf7   : > { %p1657_p12 = scmp.ne.s32.totalorder %s293_s1, %s1656_s20  ;;  %p1662_p1 = scmp.lt.s32.totalorder %s2570_s10, %s1656_s20 }
  0xf9   : > { %p1663_p3 = por %p1662_p1, %p1661_p13 }
  0xfb   : > { %p1664_p8 = pnand %p1663_p3, %p1657_p12 }
  0xfd   : > { %1667 = shalt.err (!%p1664_p8)  }
  0xfe   : > { %295 = dma.hbm_to_vmem [thread:$0]  %s283_s12, 16, %s293_s1, [#allocation2] }
  0xff   : > { %s315_s22 = sshll.u32 %s307_s0, 4  ;;  %s319_s26 = sadd.s32 8, %s2532_s15  ;;  %s316_s22 = int_to_ptr.vmem [resolvable:$true] %s315_s22 }
 0x100   : > { %s320_s7 = sshra.s32 %s319_s26, 7  ;;  %s325_s19 = sand.u32 127, %s319_s26 }
 0x101   : > { %s322_s18 = sadd.s32 %s2350_s25, %s320_s7  ;;  %s330_s30 = scalar_lea.vmem %s2535_s17, 8 [#allocation7] }
 0x102   : > { %s1258_s27 = sshll.u32 %s322_s18, 7  ;;  %s1257_s29 = sshll.u32 %s2661_s16, 4 }
 0x103   : > { %s326_s13 = sadd.s32 %s1258_s27, %s325_s19  ;;  %s306_s11 = scalar_lea.hbm %s3116_s2, %s1257_s29 }
 0x104   : > { %s2676_s1 = sld [smem:[#allocation4 + %s326_s13]]  ;;  %s1668_s12 = scalar_lea.hbm %s306_s11, 16 }
 0x105   : > { %p1669_p10 = scmp.ne.s32.totalorder %s306_s11, %s1668_s12  ;;  %p1671_p11 = scmp.lt.u32.totalorder %s306_s11, %s3116_s2 }
 0x106   : > { %p1672_p0 = scmp.lt.u32.totalorder %s2559_s4, %s1668_s12  ;;  %p1674_p4 = scmp.lt.u32.totalorder %s1668_s12, %s306_s11 }
 0x108   : > { %p1673_p2 = por %p1672_p0, %p1671_p11 }
 0x10a   : > { %p1675_p5 = por %p1674_p4, %p1673_p2 }
 0x10c   : > { %p1676_p6 = pnand %p1675_p5, %p1669_p10 }
 0x10e   : > { %1679 = shalt.err (!%p1676_p6)  }
 0x10f   : > { %s1680_s0 = scalar_lea.vmem %s316_s22, 16  ;;  %p1685_p9 = scmp.lt.s32.totalorder %s316_s22, %s2567_s21 }
 0x110   : > { %p1681_p7 = scmp.ne.s32.totalorder %s316_s22, %s1680_s0  ;;  %p1686_p12 = scmp.lt.s32.totalorder %s2570_s10, %s1680_s0 }
 0x112   : > { %p1687_p13 = por %p1686_p12, %p1685_p9 }
 0x114   : > { %p1688_p1 = pnand %p1687_p13, %p1681_p7 }
 0x116   : > { %1691 = shalt.err (!%p1688_p1)  }
 0x117   : > { %318 = dma.hbm_to_vmem [thread:$0]  %s306_s11, 16, %s316_s22, [#allocation2] }
 0x118   : > { %s338_s16 = sshll.u32 %s330_s30, 4  ;;  %s342_s26 = sadd.s32 9, %s2532_s15  ;;  %s339_s16 = int_to_ptr.vmem [resolvable:$true] %s338_s16 }
 0x119   : > { %s343_s7 = sshra.s32 %s342_s26, 7  ;;  %s348_s19 = sand.u32 127, %s342_s26 }
 0x11a   : > { %s345_s18 = sadd.s32 %s2350_s25, %s343_s7  ;;  %s353_s29 = scalar_lea.vmem %s2535_s17, 9 [#allocation7] }
 0x11b   : > { %s1260_s27 = sshll.u32 %s345_s18, 7  ;;  %s1259_s13 = sshll.u32 %s2676_s1, 4 }
 0x11c   : > { %s349_s5 = sadd.s32 %s1260_s27, %s348_s19  ;;  %s329_s9 = scalar_lea.hbm %s3116_s2, %s1259_s13 }
 0x11d   : > { %s2691_s22 = sld [smem:[#allocation4 + %s349_s5]]  ;;  %s1692_s11 = scalar_lea.hbm %s329_s9, 16 }
 0x11e   : > { %p1693_p3 = scmp.ne.s32.totalorder %s329_s9, %s1692_s11  ;;  %p1695_p8 = scmp.lt.u32.totalorder %s329_s9, %s3116_s2 }
 0x11f   : > { %p1696_p10 = scmp.lt.u32.totalorder %s2559_s4, %s1692_s11  ;;  %p1698_p0 = scmp.lt.u32.totalorder %s1692_s11, %s329_s9 }
 0x121   : > { %p1697_p11 = por %p1696_p10, %p1695_p8 }
 0x123   : > { %p1699_p2 = por %p1698_p0, %p1697_p11 }
 0x125   : > { %p1700_p4 = pnand %p1699_p2, %p1693_p3 }
 0x127   : > { %1703 = shalt.err (!%p1700_p4)  }
 0x128   : > { %s1704_s30 = scalar_lea.vmem %s339_s16, 16  ;;  %p1709_p6 = scmp.lt.s32.totalorder %s339_s16, %s2567_s21 }
 0x129   : > { %p1705_p5 = scmp.ne.s32.totalorder %s339_s16, %s1704_s30  ;;  %p1710_p7 = scmp.lt.s32.totalorder %s2570_s10, %s1704_s30 }
 0x12b   : > { %p1711_p9 = por %p1710_p7, %p1709_p6 }
 0x12d   : > { %p1712_p12 = pnand %p1711_p9, %p1705_p5 }
 0x12f   : > { %1715 = shalt.err (!%p1712_p12)  }
 0x130   : > { %341 = dma.hbm_to_vmem [thread:$0]  %s329_s9, 16, %s339_s16, [#allocation2] }
 0x131   : > { %s361_s1 = sshll.u32 %s353_s29, 4  ;;  %s365_s26 = sadd.s32 10, %s2532_s15  ;;  %s362_s1 = int_to_ptr.vmem [resolvable:$true] %s361_s1 }
 0x132   : > { %s366_s7 = sshra.s32 %s365_s26, 7  ;;  %s371_s19 = sand.u32 127, %s365_s26 }
 0x133   : > { %s368_s18 = sadd.s32 %s2350_s25, %s366_s7  ;;  %s376_s13 = scalar_lea.vmem %s2535_s17, 10 [#allocation7] }
 0x134   : > { %s1262_s27 = sshll.u32 %s368_s18, 7  ;;  %s1261_s5 = sshll.u32 %s2691_s22, 4 }
 0x135   : > { %s372_s8 = sadd.s32 %s1262_s27, %s371_s19  ;;  %s352_s20 = scalar_lea.hbm %s3116_s2, %s1261_s5 }
 0x136   : > { %s2706_s16 = sld [smem:[#allocation4 + %s372_s8]]  ;;  %s1716_s9 = scalar_lea.hbm %s352_s20, 16 }
 0x137   : > { %p1717_p13 = scmp.ne.s32.totalorder %s352_s20, %s1716_s9  ;;  %p1719_p1 = scmp.lt.u32.totalorder %s352_s20, %s3116_s2 }
 0x138   : > { %p1720_p3 = scmp.lt.u32.totalorder %s2559_s4, %s1716_s9  ;;  %p1722_p10 = scmp.lt.u32.totalorder %s1716_s9, %s352_s20 }
 0x13a   : > { %p1721_p8 = por %p1720_p3, %p1719_p1 }
 0x13c   : > { %p1723_p11 = por %p1722_p10, %p1721_p8 }
 0x13e   : > { %p1724_p0 = pnand %p1723_p11, %p1717_p13 }
 0x140   : > { %1727 = shalt.err (!%p1724_p0)  }
 0x141   : > { %s1728_s29 = scalar_lea.vmem %s362_s1, 16  ;;  %p1733_p4 = scmp.lt.s32.totalorder %s362_s1, %s2567_s21 }
 0x142   : > { %p1729_p2 = scmp.ne.s32.totalorder %s362_s1, %s1728_s29  ;;  %p1734_p5 = scmp.lt.s32.totalorder %s2570_s10, %s1728_s29 }
 0x144   : > { %p1735_p6 = por %p1734_p5, %p1733_p4 }
 0x146   : > { %p1736_p7 = pnand %p1735_p6, %p1729_p2 }
 0x148   : > { %1739 = shalt.err (!%p1736_p7)  }
 0x149   : > { %364 = dma.hbm_to_vmem [thread:$0]  %s352_s20, 16, %s362_s1, [#allocation2] }
 0x14a   : > { %s384_s22 = sshll.u32 %s376_s13, 4  ;;  %s388_s26 = sadd.s32 11, %s2532_s15  ;;  %s385_s22 = int_to_ptr.vmem [resolvable:$true] %s384_s22 }
 0x14b   : > { %s389_s7 = sshra.s32 %s388_s26, 7  ;;  %s394_s19 = sand.u32 127, %s388_s26 }
 0x14c   : > { %s391_s18 = sadd.s32 %s2350_s25, %s389_s7  ;;  %s399_s5 = scalar_lea.vmem %s2535_s17, 11 [#allocation7] }
 0x14d   : > { %s1264_s27 = sshll.u32 %s391_s18, 7  ;;  %s1263_s8 = sshll.u32 %s2706_s16, 4 }
 0x14e   : > { %s395_s12 = sadd.s32 %s1264_s27, %s394_s19  ;;  %s375_s0 = scalar_lea.hbm %s3116_s2, %s1263_s8 }
 0x14f   : > { %s2721_s1 = sld [smem:[#allocation4 + %s395_s12]]  ;;  %s1740_s20 = scalar_lea.hbm %s375_s0, 16 }
 0x150   : > { %p1741_p9 = scmp.ne.s32.totalorder %s375_s0, %s1740_s20  ;;  %p1743_p12 = scmp.lt.u32.totalorder %s375_s0, %s3116_s2 }
 0x151   : > { %p1744_p13 = scmp.lt.u32.totalorder %s2559_s4, %s1740_s20  ;;  %p1746_p3 = scmp.lt.u32.totalorder %s1740_s20, %s375_s0 }
 0x153   : > { %p1745_p1 = por %p1744_p13, %p1743_p12 }
 0x155   : > { %p1747_p8 = por %p1746_p3, %p1745_p1 }
 0x157   : > { %p1748_p10 = pnand %p1747_p8, %p1741_p9 }
 0x159   : > { %1751 = shalt.err (!%p1748_p10)  }
 0x15a   : > { %s1752_s13 = scalar_lea.vmem %s385_s22, 16  ;;  %p1757_p0 = scmp.lt.s32.totalorder %s385_s22, %s2567_s21 }
 0x15b   : > { %p1753_p11 = scmp.ne.s32.totalorder %s385_s22, %s1752_s13  ;;  %p1758_p2 = scmp.lt.s32.totalorder %s2570_s10, %s1752_s13 }
 0x15d   : > { %p1759_p4 = por %p1758_p2, %p1757_p0 }
 0x15f   : > { %p1760_p5 = pnand %p1759_p4, %p1753_p11 }
 0x161   : > { %1763 = shalt.err (!%p1760_p5)  }
 0x162   : > { %387 = dma.hbm_to_vmem [thread:$0]  %s375_s0, 16, %s385_s22, [#allocation2] }
 0x163   : > { %s407_s16 = sshll.u32 %s399_s5, 4  ;;  %s411_s26 = sadd.s32 12, %s2532_s15  ;;  %s408_s16 = int_to_ptr.vmem [resolvable:$true] %s407_s16 }
 0x164   : > { %s412_s7 = sshra.s32 %s411_s26, 7  ;;  %s417_s19 = sand.u32 127, %s411_s26 }
 0x165   : > { %s414_s18 = sadd.s32 %s2350_s25, %s412_s7  ;;  %s422_s8 = scalar_lea.vmem %s2535_s17, 12 [#allocation7] }
 0x166   : > { %s1266_s27 = sshll.u32 %s414_s18, 7  ;;  %s1265_s12 = sshll.u32 %s2721_s1, 4 }
 0x167   : > { %s418_s11 = sadd.s32 %s1266_s27, %s417_s19  ;;  %s398_s30 = scalar_lea.hbm %s3116_s2, %s1265_s12 }
 0x168   : > { %s2736_s22 = sld [smem:[#allocation4 + %s418_s11]]  ;;  %s1764_s0 = scalar_lea.hbm %s398_s30, 16 }
 0x169   : > { %p1765_p6 = scmp.ne.s32.totalorder %s398_s30, %s1764_s0  ;;  %p1767_p7 = scmp.lt.u32.totalorder %s398_s30, %s3116_s2 }
 0x16a   : > { %p1768_p9 = scmp.lt.u32.totalorder %s2559_s4, %s1764_s0  ;;  %p1770_p13 = scmp.lt.u32.totalorder %s1764_s0, %s398_s30 }
 0x16c   : > { %p1769_p12 = por %p1768_p9, %p1767_p7 }
 0x16e   : > { %p1771_p1 = por %p1770_p13, %p1769_p12 }
 0x170   : > { %p1772_p3 = pnand %p1771_p1, %p1765_p6 }
 0x172   : > { %1775 = shalt.err (!%p1772_p3)  }
 0x173   : > { %s1776_s5 = scalar_lea.vmem %s408_s16, 16  ;;  %p1781_p10 = scmp.lt.s32.totalorder %s408_s16, %s2567_s21 }
 0x174   : > { %p1777_p8 = scmp.ne.s32.totalorder %s408_s16, %s1776_s5  ;;  %p1782_p11 = scmp.lt.s32.totalorder %s2570_s10, %s1776_s5 }
 0x176   : > { %p1783_p0 = por %p1782_p11, %p1781_p10 }
 0x178   : > { %p1784_p2 = pnand %p1783_p0, %p1777_p8 }
 0x17a   : > { %1787 = shalt.err (!%p1784_p2)  }
 0x17b   : > { %410 = dma.hbm_to_vmem [thread:$0]  %s398_s30, 16, %s408_s16, [#allocation2] }
 0x17c   : > { %s430_s1 = sshll.u32 %s422_s8, 4  ;;  %s434_s26 = sadd.s32 13, %s2532_s15  ;;  %s431_s1 = int_to_ptr.vmem [resolvable:$true] %s430_s1 }
 0x17d   : > { %s435_s7 = sshra.s32 %s434_s26, 7  ;;  %s440_s19 = sand.u32 127, %s434_s26 }
 0x17e   : > { %s437_s18 = sadd.s32 %s2350_s25, %s435_s7  ;;  %s445_s12 = scalar_lea.vmem %s2535_s17, 13 [#allocation7] }
 0x17f   : > { %s1268_s27 = sshll.u32 %s437_s18, 7  ;;  %s1267_s11 = sshll.u32 %s2736_s22, 4 }
 0x180   : > { %s441_s9 = sadd.s32 %s1268_s27, %s440_s19  ;;  %s421_s29 = scalar_lea.hbm %s3116_s2, %s1267_s11 }
 0x181   : > { %s2751_s16 = sld [smem:[#allocation4 + %s441_s9]]  ;;  %s1788_s30 = scalar_lea.hbm %s421_s29, 16 }
 0x182   : > { %p1789_p4 = scmp.ne.s32.totalorder %s421_s29, %s1788_s30  ;;  %p1791_p5 = scmp.lt.u32.totalorder %s421_s29, %s3116_s2 }
 0x183   : > { %p1792_p6 = scmp.lt.u32.totalorder %s2559_s4, %s1788_s30  ;;  %p1794_p9 = scmp.lt.u32.totalorder %s1788_s30, %s421_s29 }
 0x185   : > { %p1793_p7 = por %p1792_p6, %p1791_p5 }
 0x187   : > { %p1795_p12 = por %p1794_p9, %p1793_p7 }
 0x189   : > { %p1796_p13 = pnand %p1795_p12, %p1789_p4 }
 0x18b   : > { %1799 = shalt.err (!%p1796_p13)  }
 0x18c   : > { %s1800_s8 = scalar_lea.vmem %s431_s1, 16  ;;  %p1805_p3 = scmp.lt.s32.totalorder %s431_s1, %s2567_s21 }
 0x18d   : > { %p1801_p1 = scmp.ne.s32.totalorder %s431_s1, %s1800_s8  ;;  %p1806_p8 = scmp.lt.s32.totalorder %s2570_s10, %s1800_s8 }
 0x18f   : > { %p1807_p10 = por %p1806_p8, %p1805_p3 }
 0x191   : > { %p1808_p11 = pnand %p1807_p10, %p1801_p1 }
 0x193   : > { %1811 = shalt.err (!%p1808_p11)  }
 0x194   : > { %433 = dma.hbm_to_vmem [thread:$0]  %s421_s29, 16, %s431_s1, [#allocation2] }
 0x195   : > { %s453_s22 = sshll.u32 %s445_s12, 4  ;;  %s457_s26 = sadd.s32 14, %s2532_s15  ;;  %s454_s22 = int_to_ptr.vmem [resolvable:$true] %s453_s22 }
 0x196   : > { %s458_s7 = sshra.s32 %s457_s26, 7  ;;  %s463_s19 = sand.u32 127, %s457_s26 }
 0x197   : > { %s460_s18 = sadd.s32 %s2350_s25, %s458_s7  ;;  %s468_s11 = scalar_lea.vmem %s2535_s17, 14 [#allocation7] }
 0x198   : > { %s1270_s27 = sshll.u32 %s460_s18, 7  ;;  %s1269_s9 = sshll.u32 %s2751_s16, 4 }
 0x199   : > { %s464_s20 = sadd.s32 %s1270_s27, %s463_s19  ;;  %s444_s13 = scalar_lea.hbm %s3116_s2, %s1269_s9 }
 0x19a   : > { %s2766_s1 = sld [smem:[#allocation4 + %s464_s20]]  ;;  %s1812_s29 = scalar_lea.hbm %s444_s13, 16 }
 0x19b   : > { %p1813_p0 = scmp.ne.s32.totalorder %s444_s13, %s1812_s29  ;;  %p1815_p2 = scmp.lt.u32.totalorder %s444_s13, %s3116_s2 }
 0x19c   : > { %p1816_p4 = scmp.lt.u32.totalorder %s2559_s4, %s1812_s29  ;;  %p1818_p6 = scmp.lt.u32.totalorder %s1812_s29, %s444_s13 }
 0x19e   : > { %p1817_p5 = por %p1816_p4, %p1815_p2 }
 0x1a0   : > { %p1819_p7 = por %p1818_p6, %p1817_p5 }
 0x1a2   : > { %p1820_p9 = pnand %p1819_p7, %p1813_p0 }
 0x1a4   : > { %1823 = shalt.err (!%p1820_p9)  }
 0x1a5   : > { %s1824_s12 = scalar_lea.vmem %s454_s22, 16  ;;  %p1829_p13 = scmp.lt.s32.totalorder %s454_s22, %s2567_s21 }
 0x1a6   : > { %p1825_p12 = scmp.ne.s32.totalorder %s454_s22, %s1824_s12  ;;  %p1830_p1 = scmp.lt.s32.totalorder %s2570_s10, %s1824_s12 }
 0x1a8   : > { %p1831_p3 = por %p1830_p1, %p1829_p13 }
 0x1aa   : > { %p1832_p8 = pnand %p1831_p3, %p1825_p12 }
 0x1ac   : > { %1835 = shalt.err (!%p1832_p8)  }
 0x1ad   : > { %456 = dma.hbm_to_vmem [thread:$0]  %s444_s13, 16, %s454_s22, [#allocation2] }
 0x1ae   : > { %s476_s16 = sshll.u32 %s468_s11, 4  ;;  %s480_s26 = sadd.s32 15, %s2532_s15  ;;  %s477_s16 = int_to_ptr.vmem [resolvable:$true] %s476_s16 }
 0x1af   : > { %s481_s7 = sshra.s32 %s480_s26, 7  ;;  %s486_s19 = sand.u32 127, %s480_s26 }
 0x1b0   : > { %s483_s18 = sadd.s32 %s2350_s25, %s481_s7  ;;  %s491_s9 = scalar_lea.vmem %s2535_s17, 15 [#allocation7] }
 0x1b1   : > { %s1272_s27 = sshll.u32 %s483_s18, 7  ;;  %s1271_s20 = sshll.u32 %s2766_s1, 4 }
 0x1b2   : > { %s487_s0 = sadd.s32 %s1272_s27, %s486_s19  ;;  %s467_s5 = scalar_lea.hbm %s3116_s2, %s1271_s20 }
 0x1b3   : > { %s2781_s22 = sld [smem:[#allocation4 + %s487_s0]]  ;;  %s1836_s13 = scalar_lea.hbm %s467_s5, 16 }
 0x1b4   : > { %p1837_p10 = scmp.ne.s32.totalorder %s467_s5, %s1836_s13  ;;  %p1839_p11 = scmp.lt.u32.totalorder %s467_s5, %s3116_s2 }
 0x1b5   : > { %p1840_p0 = scmp.lt.u32.totalorder %s2559_s4, %s1836_s13  ;;  %p1842_p4 = scmp.lt.u32.totalorder %s1836_s13, %s467_s5 }
 0x1b7   : > { %p1841_p2 = por %p1840_p0, %p1839_p11 }
 0x1b9   : > { %p1843_p5 = por %p1842_p4, %p1841_p2 }
 0x1bb   : > { %p1844_p6 = pnand %p1843_p5, %p1837_p10 }
 0x1bd   : > { %1847 = shalt.err (!%p1844_p6)  }
 0x1be   : > { %s1848_s11 = scalar_lea.vmem %s477_s16, 16  ;;  %p1853_p9 = scmp.lt.s32.totalorder %s477_s16, %s2567_s21 }
 0x1bf   : > { %p1849_p7 = scmp.ne.s32.totalorder %s477_s16, %s1848_s11  ;;  %p1854_p12 = scmp.lt.s32.totalorder %s2570_s10, %s1848_s11 }
 0x1c1   : > { %p1855_p13 = por %p1854_p12, %p1853_p9 }
 0x1c3   : > { %p1856_p1 = pnand %p1855_p13, %p1849_p7 }
 0x1c5   : > { %1859 = shalt.err (!%p1856_p1)  }
 0x1c6   : > { %479 = dma.hbm_to_vmem [thread:$0]  %s467_s5, 16, %s477_s16, [#allocation2] }
 0x1c7   : > { %s499_s1 = sshll.u32 %s491_s9, 4  ;;  %s503_s26 = sadd.s32 16, %s2532_s15  ;;  %s500_s1 = int_to_ptr.vmem [resolvable:$true] %s499_s1 }
 0x1c8   : > { %s504_s7 = sshra.s32 %s503_s26, 7  ;;  %s509_s19 = sand.u32 127, %s503_s26 }
 0x1c9   : > { %s506_s18 = sadd.s32 %s2350_s25, %s504_s7  ;;  %s514_s20 = scalar_lea.vmem %s2535_s17, 16 [#allocation7] }
 0x1ca   : > { %s1274_s27 = sshll.u32 %s506_s18, 7  ;;  %s1273_s0 = sshll.u32 %s2781_s22, 4 }
 0x1cb   : > { %s510_s30 = sadd.s32 %s1274_s27, %s509_s19  ;;  %s490_s8 = scalar_lea.hbm %s3116_s2, %s1273_s0 }
 0x1cc   : > { %s2796_s16 = sld [smem:[#allocation4 + %s510_s30]]  ;;  %s1860_s5 = scalar_lea.hbm %s490_s8, 16 }
 0x1cd   : > { %p1861_p3 = scmp.ne.s32.totalorder %s490_s8, %s1860_s5  ;;  %p1863_p8 = scmp.lt.u32.totalorder %s490_s8, %s3116_s2 }
 0x1ce   : > { %p1864_p10 = scmp.lt.u32.totalorder %s2559_s4, %s1860_s5  ;;  %p1866_p0 = scmp.lt.u32.totalorder %s1860_s5, %s490_s8 }
 0x1d0   : > { %p1865_p11 = por %p1864_p10, %p1863_p8 }
 0x1d2   : > { %p1867_p2 = por %p1866_p0, %p1865_p11 }
 0x1d4   : > { %p1868_p4 = pnand %p1867_p2, %p1861_p3 }
 0x1d6   : > { %1871 = shalt.err (!%p1868_p4)  }
 0x1d7   : > { %s1872_s9 = scalar_lea.vmem %s500_s1, 16  ;;  %p1877_p6 = scmp.lt.s32.totalorder %s500_s1, %s2567_s21 }
 0x1d8   : > { %p1873_p5 = scmp.ne.s32.totalorder %s500_s1, %s1872_s9  ;;  %p1878_p7 = scmp.lt.s32.totalorder %s2570_s10, %s1872_s9 }
 0x1da   : > { %p1879_p9 = por %p1878_p7, %p1877_p6 }
 0x1dc   : > { %p1880_p12 = pnand %p1879_p9, %p1873_p5 }
 0x1de   : > { %1883 = shalt.err (!%p1880_p12)  }
 0x1df   : > { %502 = dma.hbm_to_vmem [thread:$0]  %s490_s8, 16, %s500_s1, [#allocation2] }
 0x1e0   : > { %s522_s22 = sshll.u32 %s514_s20, 4  ;;  %s526_s26 = sadd.s32 17, %s2532_s15  ;;  %s523_s22 = int_to_ptr.vmem [resolvable:$true] %s522_s22 }
 0x1e1   : > { %s527_s7 = sshra.s32 %s526_s26, 7  ;;  %s532_s19 = sand.u32 127, %s526_s26 }
 0x1e2   : > { %s529_s18 = sadd.s32 %s2350_s25, %s527_s7  ;;  %s537_s0 = scalar_lea.vmem %s2535_s17, 17 [#allocation7] }
 0x1e3   : > { %s1276_s27 = sshll.u32 %s529_s18, 7  ;;  %s1275_s30 = sshll.u32 %s2796_s16, 4 }
 0x1e4   : > { %s533_s29 = sadd.s32 %s1276_s27, %s532_s19  ;;  %s513_s12 = scalar_lea.hbm %s3116_s2, %s1275_s30 }
 0x1e5   : > { %s2811_s1 = sld [smem:[#allocation4 + %s533_s29]]  ;;  %s1884_s8 = scalar_lea.hbm %s513_s12, 16 }
 0x1e6   : > { %p1885_p13 = scmp.ne.s32.totalorder %s513_s12, %s1884_s8  ;;  %p1887_p1 = scmp.lt.u32.totalorder %s513_s12, %s3116_s2 }
 0x1e7   : > { %p1888_p3 = scmp.lt.u32.totalorder %s2559_s4, %s1884_s8  ;;  %p1890_p10 = scmp.lt.u32.totalorder %s1884_s8, %s513_s12 }
 0x1e9   : > { %p1889_p8 = por %p1888_p3, %p1887_p1 }
 0x1eb   : > { %p1891_p11 = por %p1890_p10, %p1889_p8 }
 0x1ed   : > { %p1892_p0 = pnand %p1891_p11, %p1885_p13 }
 0x1ef   : > { %1895 = shalt.err (!%p1892_p0)  }
 0x1f0   : > { %s1896_s20 = scalar_lea.vmem %s523_s22, 16  ;;  %p1901_p4 = scmp.lt.s32.totalorder %s523_s22, %s2567_s21 }
 0x1f1   : > { %p1897_p2 = scmp.ne.s32.totalorder %s523_s22, %s1896_s20  ;;  %p1902_p5 = scmp.lt.s32.totalorder %s2570_s10, %s1896_s20 }
 0x1f3   : > { %p1903_p6 = por %p1902_p5, %p1901_p4 }
 0x1f5   : > { %p1904_p7 = pnand %p1903_p6, %p1897_p2 }
 0x1f7   : > { %1907 = shalt.err (!%p1904_p7)  }
 0x1f8   : > { %525 = dma.hbm_to_vmem [thread:$0]  %s513_s12, 16, %s523_s22, [#allocation2] }
 0x1f9   : > { %s545_s16 = sshll.u32 %s537_s0, 4  ;;  %s549_s26 = sadd.s32 18, %s2532_s15  ;;  %s546_s16 = int_to_ptr.vmem [resolvable:$true] %s545_s16 }
 0x1fa   : > { %s550_s7 = sshra.s32 %s549_s26, 7  ;;  %s555_s19 = sand.u32 127, %s549_s26 }
 0x1fb   : > { %s552_s18 = sadd.s32 %s2350_s25, %s550_s7  ;;  %s560_s30 = scalar_lea.vmem %s2535_s17, 18 [#allocation7] }
 0x1fc   : > { %s1278_s27 = sshll.u32 %s552_s18, 7  ;;  %s1277_s29 = sshll.u32 %s2811_s1, 4 }
 0x1fd   : > { %s556_s13 = sadd.s32 %s1278_s27, %s555_s19  ;;  %s536_s11 = scalar_lea.hbm %s3116_s2, %s1277_s29 }
 0x1fe   : > { %s2826_s22 = sld [smem:[#allocation4 + %s556_s13]]  ;;  %s1908_s12 = scalar_lea.hbm %s536_s11, 16 }
 0x1ff   : > { %p1909_p9 = scmp.ne.s32.totalorder %s536_s11, %s1908_s12  ;;  %p1911_p12 = scmp.lt.u32.totalorder %s536_s11, %s3116_s2 }
 0x200   : > { %p1912_p13 = scmp.lt.u32.totalorder %s2559_s4, %s1908_s12  ;;  %p1914_p3 = scmp.lt.u32.totalorder %s1908_s12, %s536_s11 }
 0x202   : > { %p1913_p1 = por %p1912_p13, %p1911_p12 }
 0x204   : > { %p1915_p8 = por %p1914_p3, %p1913_p1 }
 0x206   : > { %p1916_p10 = pnand %p1915_p8, %p1909_p9 }
 0x208   : > { %1919 = shalt.err (!%p1916_p10)  }
 0x209   : > { %s1920_s0 = scalar_lea.vmem %s546_s16, 16  ;;  %p1925_p0 = scmp.lt.s32.totalorder %s546_s16, %s2567_s21 }
 0x20a   : > { %p1921_p11 = scmp.ne.s32.totalorder %s546_s16, %s1920_s0  ;;  %p1926_p2 = scmp.lt.s32.totalorder %s2570_s10, %s1920_s0 }
 0x20c   : > { %p1927_p4 = por %p1926_p2, %p1925_p0 }
 0x20e   : > { %p1928_p5 = pnand %p1927_p4, %p1921_p11 }
 0x210   : > { %1931 = shalt.err (!%p1928_p5)  }
 0x211   : > { %548 = dma.hbm_to_vmem [thread:$0]  %s536_s11, 16, %s546_s16, [#allocation2] }
 0x212   : > { %s568_s1 = sshll.u32 %s560_s30, 4  ;;  %s572_s26 = sadd.s32 19, %s2532_s15  ;;  %s569_s1 = int_to_ptr.vmem [resolvable:$true] %s568_s1 }
 0x213   : > { %s573_s7 = sshra.s32 %s572_s26, 7  ;;  %s578_s19 = sand.u32 127, %s572_s26 }
 0x214   : > { %s575_s18 = sadd.s32 %s2350_s25, %s573_s7  ;;  %s583_s29 = scalar_lea.vmem %s2535_s17, 19 [#allocation7] }
 0x215   : > { %s1280_s27 = sshll.u32 %s575_s18, 7  ;;  %s1279_s13 = sshll.u32 %s2826_s22, 4 }
 0x216   : > { %s579_s5 = sadd.s32 %s1280_s27, %s578_s19  ;;  %s559_s9 = scalar_lea.hbm %s3116_s2, %s1279_s13 }
 0x217   : > { %s2841_s16 = sld [smem:[#allocation4 + %s579_s5]]  ;;  %s1932_s11 = scalar_lea.hbm %s559_s9, 16 }
 0x218   : > { %p1933_p6 = scmp.ne.s32.totalorder %s559_s9, %s1932_s11  ;;  %p1935_p7 = scmp.lt.u32.totalorder %s559_s9, %s3116_s2 }
 0x219   : > { %p1936_p9 = scmp.lt.u32.totalorder %s2559_s4, %s1932_s11  ;;  %p1938_p13 = scmp.lt.u32.totalorder %s1932_s11, %s559_s9 }
 0x21b   : > { %p1937_p12 = por %p1936_p9, %p1935_p7 }
 0x21d   : > { %p1939_p1 = por %p1938_p13, %p1937_p12 }
 0x21f   : > { %p1940_p3 = pnand %p1939_p1, %p1933_p6 }
 0x221   : > { %1943 = shalt.err (!%p1940_p3)  }
 0x222   : > { %s1944_s30 = scalar_lea.vmem %s569_s1, 16  ;;  %p1949_p10 = scmp.lt.s32.totalorder %s569_s1, %s2567_s21 }
 0x223   : > { %p1945_p8 = scmp.ne.s32.totalorder %s569_s1, %s1944_s30  ;;  %p1950_p11 = scmp.lt.s32.totalorder %s2570_s10, %s1944_s30 }
 0x225   : > { %p1951_p0 = por %p1950_p11, %p1949_p10 }
 0x227   : > { %p1952_p2 = pnand %p1951_p0, %p1945_p8 }
 0x229   : > { %1955 = shalt.err (!%p1952_p2)  }
 0x22a   : > { %571 = dma.hbm_to_vmem [thread:$0]  %s559_s9, 16, %s569_s1, [#allocation2] }
 0x22b   : > { %s591_s22 = sshll.u32 %s583_s29, 4  ;;  %s595_s26 = sadd.s32 20, %s2532_s15  ;;  %s592_s22 = int_to_ptr.vmem [resolvable:$true] %s591_s22 }
 0x22c   : > { %s596_s7 = sshra.s32 %s595_s26, 7  ;;  %s601_s19 = sand.u32 127, %s595_s26 }
 0x22d   : > { %s598_s18 = sadd.s32 %s2350_s25, %s596_s7  ;;  %s606_s13 = scalar_lea.vmem %s2535_s17, 20 [#allocation7] }
 0x22e   : > { %s1282_s27 = sshll.u32 %s598_s18, 7  ;;  %s1281_s5 = sshll.u32 %s2841_s16, 4 }
 0x22f   : > { %s602_s8 = sadd.s32 %s1282_s27, %s601_s19  ;;  %s582_s20 = scalar_lea.hbm %s3116_s2, %s1281_s5 }
 0x230   : > { %s2856_s1 = sld [smem:[#allocation4 + %s602_s8]]  ;;  %s1956_s9 = scalar_lea.hbm %s582_s20, 16 }
 0x231   : > { %p1957_p4 = scmp.ne.s32.totalorder %s582_s20, %s1956_s9  ;;  %p1959_p5 = scmp.lt.u32.totalorder %s582_s20, %s3116_s2 }
 0x232   : > { %p1960_p6 = scmp.lt.u32.totalorder %s2559_s4, %s1956_s9  ;;  %p1962_p9 = scmp.lt.u32.totalorder %s1956_s9, %s582_s20 }
 0x234   : > { %p1961_p7 = por %p1960_p6, %p1959_p5 }
 0x236   : > { %p1963_p12 = por %p1962_p9, %p1961_p7 }
 0x238   : > { %p1964_p13 = pnand %p1963_p12, %p1957_p4 }
 0x23a   : > { %1967 = shalt.err (!%p1964_p13)  }
 0x23b   : > { %s1968_s29 = scalar_lea.vmem %s592_s22, 16  ;;  %p1973_p3 = scmp.lt.s32.totalorder %s592_s22, %s2567_s21 }
 0x23c   : > { %p1969_p1 = scmp.ne.s32.totalorder %s592_s22, %s1968_s29  ;;  %p1974_p8 = scmp.lt.s32.totalorder %s2570_s10, %s1968_s29 }
 0x23e   : > { %p1975_p10 = por %p1974_p8, %p1973_p3 }
 0x240   : > { %p1976_p11 = pnand %p1975_p10, %p1969_p1 }
 0x242   : > { %1979 = shalt.err (!%p1976_p11)  }
 0x243   : > { %594 = dma.hbm_to_vmem [thread:$0]  %s582_s20, 16, %s592_s22, [#allocation2] }
 0x244   : > { %s614_s16 = sshll.u32 %s606_s13, 4  ;;  %s618_s26 = sadd.s32 21, %s2532_s15  ;;  %s615_s16 = int_to_ptr.vmem [resolvable:$true] %s614_s16 }
 0x245   : > { %s619_s7 = sshra.s32 %s618_s26, 7  ;;  %s624_s19 = sand.u32 127, %s618_s26 }
 0x246   : > { %s621_s18 = sadd.s32 %s2350_s25, %s619_s7  ;;  %s629_s5 = scalar_lea.vmem %s2535_s17, 21 [#allocation7] }
 0x247   : > { %s1284_s27 = sshll.u32 %s621_s18, 7  ;;  %s1283_s8 = sshll.u32 %s2856_s1, 4 }
 0x248   : > { %s625_s12 = sadd.s32 %s1284_s27, %s624_s19  ;;  %s605_s0 = scalar_lea.hbm %s3116_s2, %s1283_s8 }
 0x249   : > { %s2871_s22 = sld [smem:[#allocation4 + %s625_s12]]  ;;  %s1980_s20 = scalar_lea.hbm %s605_s0, 16 }
 0x24a   : > { %p1981_p0 = scmp.ne.s32.totalorder %s605_s0, %s1980_s20  ;;  %p1983_p2 = scmp.lt.u32.totalorder %s605_s0, %s3116_s2 }
 0x24b   : > { %p1984_p4 = scmp.lt.u32.totalorder %s2559_s4, %s1980_s20  ;;  %p1986_p6 = scmp.lt.u32.totalorder %s1980_s20, %s605_s0 }
 0x24d   : > { %p1985_p5 = por %p1984_p4, %p1983_p2 }
 0x24f   : > { %p1987_p7 = por %p1986_p6, %p1985_p5 }
 0x251   : > { %p1988_p9 = pnand %p1987_p7, %p1981_p0 }
 0x253   : > { %1991 = shalt.err (!%p1988_p9)  }
 0x254   : > { %s1992_s13 = scalar_lea.vmem %s615_s16, 16  ;;  %p1997_p13 = scmp.lt.s32.totalorder %s615_s16, %s2567_s21 }
 0x255   : > { %p1993_p12 = scmp.ne.s32.totalorder %s615_s16, %s1992_s13  ;;  %p1998_p1 = scmp.lt.s32.totalorder %s2570_s10, %s1992_s13 }
 0x257   : > { %p1999_p3 = por %p1998_p1, %p1997_p13 }
 0x259   : > { %p2000_p8 = pnand %p1999_p3, %p1993_p12 }
 0x25b   : > { %2003 = shalt.err (!%p2000_p8)  }
 0x25c   : > { %617 = dma.hbm_to_vmem [thread:$0]  %s605_s0, 16, %s615_s16, [#allocation2] }
 0x25d   : > { %s637_s1 = sshll.u32 %s629_s5, 4  ;;  %s641_s26 = sadd.s32 22, %s2532_s15  ;;  %s638_s1 = int_to_ptr.vmem [resolvable:$true] %s637_s1 }
 0x25e   : > { %s642_s7 = sshra.s32 %s641_s26, 7  ;;  %s647_s19 = sand.u32 127, %s641_s26 }
 0x25f   : > { %s644_s18 = sadd.s32 %s2350_s25, %s642_s7  ;;  %s652_s8 = scalar_lea.vmem %s2535_s17, 22 [#allocation7] }
 0x260   : > { %s1286_s27 = sshll.u32 %s644_s18, 7  ;;  %s1285_s12 = sshll.u32 %s2871_s22, 4 }
 0x261   : > { %s648_s11 = sadd.s32 %s1286_s27, %s647_s19  ;;  %s628_s30 = scalar_lea.hbm %s3116_s2, %s1285_s12 }
 0x262   : > { %s2886_s16 = sld [smem:[#allocation4 + %s648_s11]]  ;;  %s2004_s0 = scalar_lea.hbm %s628_s30, 16 }
 0x263   : > { %p2005_p10 = scmp.ne.s32.totalorder %s628_s30, %s2004_s0  ;;  %p2007_p11 = scmp.lt.u32.totalorder %s628_s30, %s3116_s2 }
 0x264   : > { %p2008_p0 = scmp.lt.u32.totalorder %s2559_s4, %s2004_s0  ;;  %p2010_p4 = scmp.lt.u32.totalorder %s2004_s0, %s628_s30 }
 0x266   : > { %p2009_p2 = por %p2008_p0, %p2007_p11 }
 0x268   : > { %p2011_p5 = por %p2010_p4, %p2009_p2 }
 0x26a   : > { %p2012_p6 = pnand %p2011_p5, %p2005_p10 }
 0x26c   : > { %2015 = shalt.err (!%p2012_p6)  }
 0x26d   : > { %s2016_s5 = scalar_lea.vmem %s638_s1, 16  ;;  %p2021_p9 = scmp.lt.s32.totalorder %s638_s1, %s2567_s21 }
 0x26e   : > { %p2017_p7 = scmp.ne.s32.totalorder %s638_s1, %s2016_s5  ;;  %p2022_p12 = scmp.lt.s32.totalorder %s2570_s10, %s2016_s5 }
 0x270   : > { %p2023_p13 = por %p2022_p12, %p2021_p9 }
 0x272   : > { %p2024_p1 = pnand %p2023_p13, %p2017_p7 }
 0x274   : > { %2027 = shalt.err (!%p2024_p1)  }
 0x275   : > { %640 = dma.hbm_to_vmem [thread:$0]  %s628_s30, 16, %s638_s1, [#allocation2] }
 0x276   : > { %s660_s22 = sshll.u32 %s652_s8, 4  ;;  %s664_s26 = sadd.s32 23, %s2532_s15  ;;  %s661_s22 = int_to_ptr.vmem [resolvable:$true] %s660_s22 }
 0x277   : > { %s665_s7 = sshra.s32 %s664_s26, 7  ;;  %s670_s19 = sand.u32 127, %s664_s26 }
 0x278   : > { %s667_s18 = sadd.s32 %s2350_s25, %s665_s7  ;;  %s675_s12 = scalar_lea.vmem %s2535_s17, 23 [#allocation7] }
 0x279   : > { %s1288_s27 = sshll.u32 %s667_s18, 7  ;;  %s1287_s11 = sshll.u32 %s2886_s16, 4 }
 0x27a   : > { %s671_s9 = sadd.s32 %s1288_s27, %s670_s19  ;;  %s651_s29 = scalar_lea.hbm %s3116_s2, %s1287_s11 }
 0x27b   : > { %s2901_s1 = sld [smem:[#allocation4 + %s671_s9]]  ;;  %s2028_s30 = scalar_lea.hbm %s651_s29, 16 }
 0x27c   : > { %p2029_p3 = scmp.ne.s32.totalorder %s651_s29, %s2028_s30  ;;  %p2031_p8 = scmp.lt.u32.totalorder %s651_s29, %s3116_s2 }
 0x27d   : > { %p2032_p10 = scmp.lt.u32.totalorder %s2559_s4, %s2028_s30  ;;  %p2034_p0 = scmp.lt.u32.totalorder %s2028_s30, %s651_s29 }
 0x27f   : > { %p2033_p11 = por %p2032_p10, %p2031_p8 }
 0x281   : > { %p2035_p2 = por %p2034_p0, %p2033_p11 }
 0x283   : > { %p2036_p4 = pnand %p2035_p2, %p2029_p3 }
 0x285   : > { %2039 = shalt.err (!%p2036_p4)  }
 0x286   : > { %s2040_s8 = scalar_lea.vmem %s661_s22, 16  ;;  %p2045_p6 = scmp.lt.s32.totalorder %s661_s22, %s2567_s21 }
 0x287   : > { %p2041_p5 = scmp.ne.s32.totalorder %s661_s22, %s2040_s8  ;;  %p2046_p7 = scmp.lt.s32.totalorder %s2570_s10, %s2040_s8 }
 0x289   : > { %p2047_p9 = por %p2046_p7, %p2045_p6 }
 0x28b   : > { %p2048_p12 = pnand %p2047_p9, %p2041_p5 }
 0x28d   : > { %2051 = shalt.err (!%p2048_p12)  }
 0x28e   : > { %663 = dma.hbm_to_vmem [thread:$0]  %s651_s29, 16, %s661_s22, [#allocation2] }
 0x28f   : > { %s683_s16 = sshll.u32 %s675_s12, 4  ;;  %s687_s26 = sadd.s32 24, %s2532_s15  ;;  %s684_s16 = int_to_ptr.vmem [resolvable:$true] %s683_s16 }
 0x290   : > { %s688_s7 = sshra.s32 %s687_s26, 7  ;;  %s693_s19 = sand.u32 127, %s687_s26 }
 0x291   : > { %s690_s18 = sadd.s32 %s2350_s25, %s688_s7  ;;  %s698_s11 = scalar_lea.vmem %s2535_s17, 24 [#allocation7] }
 0x292   : > { %s1290_s27 = sshll.u32 %s690_s18, 7  ;;  %s1289_s9 = sshll.u32 %s2901_s1, 4 }
 0x293   : > { %s694_s20 = sadd.s32 %s1290_s27, %s693_s19  ;;  %s674_s13 = scalar_lea.hbm %s3116_s2, %s1289_s9 }
 0x294   : > { %s2916_s22 = sld [smem:[#allocation4 + %s694_s20]]  ;;  %s2052_s29 = scalar_lea.hbm %s674_s13, 16 }
 0x295   : > { %p2053_p13 = scmp.ne.s32.totalorder %s674_s13, %s2052_s29  ;;  %p2055_p1 = scmp.lt.u32.totalorder %s674_s13, %s3116_s2 }
 0x296   : > { %p2056_p3 = scmp.lt.u32.totalorder %s2559_s4, %s2052_s29  ;;  %p2058_p10 = scmp.lt.u32.totalorder %s2052_s29, %s674_s13 }
 0x298   : > { %p2057_p8 = por %p2056_p3, %p2055_p1 }
 0x29a   : > { %p2059_p11 = por %p2058_p10, %p2057_p8 }
 0x29c   : > { %p2060_p0 = pnand %p2059_p11, %p2053_p13 }
 0x29e   : > { %2063 = shalt.err (!%p2060_p0)  }
 0x29f   : > { %s2064_s12 = scalar_lea.vmem %s684_s16, 16  ;;  %p2069_p4 = scmp.lt.s32.totalorder %s684_s16, %s2567_s21 }
 0x2a0   : > { %p2065_p2 = scmp.ne.s32.totalorder %s684_s16, %s2064_s12  ;;  %p2070_p5 = scmp.lt.s32.totalorder %s2570_s10, %s2064_s12 }
 0x2a2   : > { %p2071_p6 = por %p2070_p5, %p2069_p4 }
 0x2a4   : > { %p2072_p7 = pnand %p2071_p6, %p2065_p2 }
 0x2a6   : > { %2075 = shalt.err (!%p2072_p7)  }
 0x2a7   : > { %686 = dma.hbm_to_vmem [thread:$0]  %s674_s13, 16, %s684_s16, [#allocation2] }
 0x2a8   : > { %s706_s1 = sshll.u32 %s698_s11, 4  ;;  %s710_s26 = sadd.s32 25, %s2532_s15  ;;  %s707_s1 = int_to_ptr.vmem [resolvable:$true] %s706_s1 }
 0x2a9   : > { %s711_s7 = sshra.s32 %s710_s26, 7  ;;  %s716_s19 = sand.u32 127, %s710_s26 }
 0x2aa   : > { %s713_s18 = sadd.s32 %s2350_s25, %s711_s7  ;;  %s721_s9 = scalar_lea.vmem %s2535_s17, 25 [#allocation7] }
 0x2ab   : > { %s1292_s27 = sshll.u32 %s713_s18, 7  ;;  %s1291_s20 = sshll.u32 %s2916_s22, 4 }
 0x2ac   : > { %s717_s0 = sadd.s32 %s1292_s27, %s716_s19  ;;  %s697_s5 = scalar_lea.hbm %s3116_s2, %s1291_s20 }
 0x2ad   : > { %s2931_s16 = sld [smem:[#allocation4 + %s717_s0]]  ;;  %s2076_s13 = scalar_lea.hbm %s697_s5, 16 }
 0x2ae   : > { %p2077_p9 = scmp.ne.s32.totalorder %s697_s5, %s2076_s13  ;;  %p2079_p12 = scmp.lt.u32.totalorder %s697_s5, %s3116_s2 }
 0x2af   : > { %p2080_p13 = scmp.lt.u32.totalorder %s2559_s4, %s2076_s13  ;;  %p2082_p3 = scmp.lt.u32.totalorder %s2076_s13, %s697_s5 }
 0x2b1   : > { %p2081_p1 = por %p2080_p13, %p2079_p12 }
 0x2b3   : > { %p2083_p8 = por %p2082_p3, %p2081_p1 }
 0x2b5   : > { %p2084_p10 = pnand %p2083_p8, %p2077_p9 }
 0x2b7   : > { %2087 = shalt.err (!%p2084_p10)  }
 0x2b8   : > { %s2088_s11 = scalar_lea.vmem %s707_s1, 16  ;;  %p2093_p0 = scmp.lt.s32.totalorder %s707_s1, %s2567_s21 }
 0x2b9   : > { %p2089_p11 = scmp.ne.s32.totalorder %s707_s1, %s2088_s11  ;;  %p2094_p2 = scmp.lt.s32.totalorder %s2570_s10, %s2088_s11 }
 0x2bb   : > { %p2095_p4 = por %p2094_p2, %p2093_p0 }
 0x2bd   : > { %p2096_p5 = pnand %p2095_p4, %p2089_p11 }
 0x2bf   : > { %2099 = shalt.err (!%p2096_p5)  }
 0x2c0   : > { %709 = dma.hbm_to_vmem [thread:$0]  %s697_s5, 16, %s707_s1, [#allocation2] }
 0x2c1   : > { %s729_s22 = sshll.u32 %s721_s9, 4  ;;  %s733_s26 = sadd.s32 26, %s2532_s15  ;;  %s730_s22 = int_to_ptr.vmem [resolvable:$true] %s729_s22 }
 0x2c2   : > { %s734_s7 = sshra.s32 %s733_s26, 7  ;;  %s739_s19 = sand.u32 127, %s733_s26 }
 0x2c3   : > { %s736_s18 = sadd.s32 %s2350_s25, %s734_s7  ;;  %s744_s20 = scalar_lea.vmem %s2535_s17, 26 [#allocation7] }
 0x2c4   : > { %s1294_s27 = sshll.u32 %s736_s18, 7  ;;  %s1293_s0 = sshll.u32 %s2931_s16, 4 }
 0x2c5   : > { %s740_s30 = sadd.s32 %s1294_s27, %s739_s19  ;;  %s720_s8 = scalar_lea.hbm %s3116_s2, %s1293_s0 }
 0x2c6   : > { %s2946_s1 = sld [smem:[#allocation4 + %s740_s30]]  ;;  %s2100_s5 = scalar_lea.hbm %s720_s8, 16 }
 0x2c7   : > { %p2101_p6 = scmp.ne.s32.totalorder %s720_s8, %s2100_s5  ;;  %p2103_p7 = scmp.lt.u32.totalorder %s720_s8, %s3116_s2 }
 0x2c8   : > { %p2104_p9 = scmp.lt.u32.totalorder %s2559_s4, %s2100_s5  ;;  %p2106_p13 = scmp.lt.u32.totalorder %s2100_s5, %s720_s8 }
 0x2ca   : > { %p2105_p12 = por %p2104_p9, %p2103_p7 }
 0x2cc   : > { %p2107_p1 = por %p2106_p13, %p2105_p12 }
 0x2ce   : > { %p2108_p3 = pnand %p2107_p1, %p2101_p6 }
 0x2d0   : > { %2111 = shalt.err (!%p2108_p3)  }
 0x2d1   : > { %s2112_s9 = scalar_lea.vmem %s730_s22, 16  ;;  %p2117_p10 = scmp.lt.s32.totalorder %s730_s22, %s2567_s21 }
 0x2d2   : > { %p2113_p8 = scmp.ne.s32.totalorder %s730_s22, %s2112_s9  ;;  %p2118_p11 = scmp.lt.s32.totalorder %s2570_s10, %s2112_s9 }
 0x2d4   : > { %p2119_p0 = por %p2118_p11, %p2117_p10 }
 0x2d6   : > { %p2120_p2 = pnand %p2119_p0, %p2113_p8 }
 0x2d8   : > { %2123 = shalt.err (!%p2120_p2)  }
 0x2d9   : > { %732 = dma.hbm_to_vmem [thread:$0]  %s720_s8, 16, %s730_s22, [#allocation2] }
 0x2da   : > { %s752_s16 = sshll.u32 %s744_s20, 4  ;;  %s756_s26 = sadd.s32 27, %s2532_s15  ;;  %s753_s16 = int_to_ptr.vmem [resolvable:$true] %s752_s16 }
 0x2db   : > { %s757_s7 = sshra.s32 %s756_s26, 7  ;;  %s762_s19 = sand.u32 127, %s756_s26 }
 0x2dc   : > { %s759_s18 = sadd.s32 %s2350_s25, %s757_s7  ;;  %s767_s0 = scalar_lea.vmem %s2535_s17, 27 [#allocation7] }
 0x2dd   : > { %s1296_s27 = sshll.u32 %s759_s18, 7  ;;  %s1295_s30 = sshll.u32 %s2946_s1, 4 }
 0x2de   : > { %s763_s29 = sadd.s32 %s1296_s27, %s762_s19  ;;  %s743_s12 = scalar_lea.hbm %s3116_s2, %s1295_s30 }
 0x2df   : > { %s2961_s22 = sld [smem:[#allocation4 + %s763_s29]]  ;;  %s2124_s8 = scalar_lea.hbm %s743_s12, 16 }
 0x2e0   : > { %p2125_p4 = scmp.ne.s32.totalorder %s743_s12, %s2124_s8  ;;  %p2127_p5 = scmp.lt.u32.totalorder %s743_s12, %s3116_s2 }
 0x2e1   : > { %p2128_p6 = scmp.lt.u32.totalorder %s2559_s4, %s2124_s8  ;;  %p2130_p9 = scmp.lt.u32.totalorder %s2124_s8, %s743_s12 }
 0x2e3   : > { %p2129_p7 = por %p2128_p6, %p2127_p5 }
 0x2e5   : > { %p2131_p12 = por %p2130_p9, %p2129_p7 }
 0x2e7   : > { %p2132_p13 = pnand %p2131_p12, %p2125_p4 }
 0x2e9   : > { %2135 = shalt.err (!%p2132_p13)  }
 0x2ea   : > { %s2136_s20 = scalar_lea.vmem %s753_s16, 16  ;;  %p2141_p3 = scmp.lt.s32.totalorder %s753_s16, %s2567_s21 }
 0x2eb   : > { %p2137_p1 = scmp.ne.s32.totalorder %s753_s16, %s2136_s20  ;;  %p2142_p8 = scmp.lt.s32.totalorder %s2570_s10, %s2136_s20 }
 0x2ed   : > { %p2143_p10 = por %p2142_p8, %p2141_p3 }
 0x2ef   : > { %p2144_p11 = pnand %p2143_p10, %p2137_p1 }
 0x2f1   : > { %2147 = shalt.err (!%p2144_p11)  }
 0x2f2   : > { %755 = dma.hbm_to_vmem [thread:$0]  %s743_s12, 16, %s753_s16, [#allocation2] }
 0x2f3   : > { %s775_s1 = sshll.u32 %s767_s0, 4  ;;  %s779_s26 = sadd.s32 28, %s2532_s15  ;;  %s776_s1 = int_to_ptr.vmem [resolvable:$true] %s775_s1 }
 0x2f4   : > { %s780_s7 = sshra.s32 %s779_s26, 7  ;;  %s785_s19 = sand.u32 127, %s779_s26 }
 0x2f5   : > { %s782_s18 = sadd.s32 %s2350_s25, %s780_s7  ;;  %s790_s30 = scalar_lea.vmem %s2535_s17, 28 [#allocation7] }
 0x2f6   : > { %s1298_s27 = sshll.u32 %s782_s18, 7  ;;  %s1297_s29 = sshll.u32 %s2961_s22, 4 }
 0x2f7   : > { %s786_s13 = sadd.s32 %s1298_s27, %s785_s19  ;;  %s766_s11 = scalar_lea.hbm %s3116_s2, %s1297_s29 }
 0x2f8   : > { %s2976_s16 = sld [smem:[#allocation4 + %s786_s13]]  ;;  %s2148_s12 = scalar_lea.hbm %s766_s11, 16 }
 0x2f9   : > { %p2149_p0 = scmp.ne.s32.totalorder %s766_s11, %s2148_s12  ;;  %p2151_p2 = scmp.lt.u32.totalorder %s766_s11, %s3116_s2 }
 0x2fa   : > { %p2152_p4 = scmp.lt.u32.totalorder %s2559_s4, %s2148_s12  ;;  %p2154_p6 = scmp.lt.u32.totalorder %s2148_s12, %s766_s11 }
 0x2fc   : > { %p2153_p5 = por %p2152_p4, %p2151_p2 }
 0x2fe   : > { %p2155_p7 = por %p2154_p6, %p2153_p5 }
 0x300   : > { %p2156_p9 = pnand %p2155_p7, %p2149_p0 }
 0x302   : > { %2159 = shalt.err (!%p2156_p9)  }
 0x303   : > { %s2160_s0 = scalar_lea.vmem %s776_s1, 16  ;;  %p2165_p13 = scmp.lt.s32.totalorder %s776_s1, %s2567_s21 }
 0x304   : > { %p2161_p12 = scmp.ne.s32.totalorder %s776_s1, %s2160_s0  ;;  %p2166_p1 = scmp.lt.s32.totalorder %s2570_s10, %s2160_s0 }
 0x306   : > { %p2167_p3 = por %p2166_p1, %p2165_p13 }
 0x308   : > { %p2168_p8 = pnand %p2167_p3, %p2161_p12 }
 0x30a   : > { %2171 = shalt.err (!%p2168_p8)  }
 0x30b   : > { %778 = dma.hbm_to_vmem [thread:$0]  %s766_s11, 16, %s776_s1, [#allocation2] }
 0x30c   : > { %s798_s22 = sshll.u32 %s790_s30, 4  ;;  %s802_s26 = sadd.s32 29, %s2532_s15  ;;  %s799_s22 = int_to_ptr.vmem [resolvable:$true] %s798_s22 }
 0x30d   : > { %s803_s7 = sshra.s32 %s802_s26, 7  ;;  %s808_s19 = sand.u32 127, %s802_s26 }
 0x30e   : > { %s805_s18 = sadd.s32 %s2350_s25, %s803_s7  ;;  %s813_s29 = scalar_lea.vmem %s2535_s17, 29 [#allocation7] }
 0x30f   : > { %s1300_s27 = sshll.u32 %s805_s18, 7  ;;  %s1299_s13 = sshll.u32 %s2976_s16, 4 }
 0x310   : > { %s809_s5 = sadd.s32 %s1300_s27, %s808_s19  ;;  %s789_s9 = scalar_lea.hbm %s3116_s2, %s1299_s13 }
 0x311   : > { %s2991_s1 = sld [smem:[#allocation4 + %s809_s5]]  ;;  %s2172_s11 = scalar_lea.hbm %s789_s9, 16 }
 0x312   : > { %p2173_p10 = scmp.ne.s32.totalorder %s789_s9, %s2172_s11  ;;  %p2175_p11 = scmp.lt.u32.totalorder %s789_s9, %s3116_s2 }
 0x313   : > { %p2176_p0 = scmp.lt.u32.totalorder %s2559_s4, %s2172_s11  ;;  %p2178_p4 = scmp.lt.u32.totalorder %s2172_s11, %s789_s9 }
 0x315   : > { %p2177_p2 = por %p2176_p0, %p2175_p11 }
 0x317   : > { %p2179_p5 = por %p2178_p4, %p2177_p2 }
 0x319   : > { %p2180_p6 = pnand %p2179_p5, %p2173_p10 }
 0x31b   : > { %2183 = shalt.err (!%p2180_p6)  }
 0x31c   : > { %s2184_s30 = scalar_lea.vmem %s799_s22, 16  ;;  %p2189_p9 = scmp.lt.s32.totalorder %s799_s22, %s2567_s21 }
 0x31d   : > { %p2185_p7 = scmp.ne.s32.totalorder %s799_s22, %s2184_s30  ;;  %p2190_p12 = scmp.lt.s32.totalorder %s2570_s10, %s2184_s30 }
 0x31f   : > { %p2191_p13 = por %p2190_p12, %p2189_p9 }
 0x321   : > { %p2192_p1 = pnand %p2191_p13, %p2185_p7 }
 0x323   : > { %2195 = shalt.err (!%p2192_p1)  }
 0x324   : > { %801 = dma.hbm_to_vmem [thread:$0]  %s789_s9, 16, %s799_s22, [#allocation2] }
 0x325   : > { %s821_s16 = sshll.u32 %s813_s29, 4  ;;  %s825_s26 = sadd.s32 30, %s2532_s15  ;;  %s822_s16 = int_to_ptr.vmem [resolvable:$true] %s821_s16 }
 0x326   : > { %s826_s7 = sshra.s32 %s825_s26, 7  ;;  %s831_s19 = sand.u32 127, %s825_s26 }
 0x327   : > { %s828_s18 = sadd.s32 %s2350_s25, %s826_s7  ;;  %s836_s13 = scalar_lea.vmem %s2535_s17, 30 [#allocation7] }
 0x328   : > { %s1302_s27 = sshll.u32 %s828_s18, 7  ;;  %s1301_s5 = sshll.u32 %s2991_s1, 4 }
 0x329   : > { %s832_s8 = sadd.s32 %s1302_s27, %s831_s19  ;;  %s812_s20 = scalar_lea.hbm %s3116_s2, %s1301_s5 }
 0x32a   : > { %s3006_s22 = sld [smem:[#allocation4 + %s832_s8]]  ;;  %s2196_s9 = scalar_lea.hbm %s812_s20, 16 }
 0x32b   : > { %p2197_p3 = scmp.ne.s32.totalorder %s812_s20, %s2196_s9  ;;  %p2199_p8 = scmp.lt.u32.totalorder %s812_s20, %s3116_s2 }
 0x32c   : > { %p2200_p10 = scmp.lt.u32.totalorder %s2559_s4, %s2196_s9  ;;  %p2202_p0 = scmp.lt.u32.totalorder %s2196_s9, %s812_s20 }
 0x32e   : > { %p2201_p11 = por %p2200_p10, %p2199_p8 }
 0x330   : > { %p2203_p2 = por %p2202_p0, %p2201_p11 }
 0x332   : > { %p2204_p4 = pnand %p2203_p2, %p2197_p3 }
 0x334   : > { %2207 = shalt.err (!%p2204_p4)  }
 0x335   : > { %s2208_s29 = scalar_lea.vmem %s822_s16, 16  ;;  %p2213_p6 = scmp.lt.s32.totalorder %s822_s16, %s2567_s21 }
 0x336   : > { %p2209_p5 = scmp.ne.s32.totalorder %s822_s16, %s2208_s29  ;;  %p2214_p7 = scmp.lt.s32.totalorder %s2570_s10, %s2208_s29 }
 0x338   : > { %p2215_p9 = por %p2214_p7, %p2213_p6 }
 0x33a   : > { %p2216_p12 = pnand %p2215_p9, %p2209_p5 }
 0x33c   : > { %2219 = shalt.err (!%p2216_p12)  }
 0x33d   : > { %824 = dma.hbm_to_vmem [thread:$0]  %s812_s20, 16, %s822_s16, [#allocation2] }
 0x33e   : > { %s844_s1 = sshll.u32 %s836_s13, 4  ;;  %s848_s26 = sadd.s32 31, %s2532_s15  ;;  %s845_s1 = int_to_ptr.vmem [resolvable:$true] %s844_s1 }
 0x33f   : > { %s849_s7 = sshra.s32 %s848_s26, 7  ;;  %s854_s19 = sand.u32 127, %s848_s26 }
 0x340   : > { %s851_s18 = sadd.s32 %s2350_s25, %s849_s7  ;;  %s859_s5 = scalar_lea.vmem %s2535_s17, 31 [#allocation7] }
 0x341   : > { %s1304_s27 = sshll.u32 %s851_s18, 7  ;;  %s1303_s8 = sshll.u32 %s3006_s22, 4 }
 0x342   : > { %s855_s12 = sadd.s32 %s1304_s27, %s854_s19  ;;  %s835_s0 = scalar_lea.hbm %s3116_s2, %s1303_s8 }
 0x343   : > { %s856_s16 = sld [smem:[#allocation4 + %s855_s12]]  ;;  %s2220_s20 = scalar_lea.hbm %s835_s0, 16 }
 0x344   : > { %p2221_p13 = scmp.ne.s32.totalorder %s835_s0, %s2220_s20  ;;  %p2223_p1 = scmp.lt.u32.totalorder %s835_s0, %s3116_s2 }
 0x345   : > { %p2224_p3 = scmp.lt.u32.totalorder %s2559_s4, %s2220_s20  ;;  %p2226_p10 = scmp.lt.u32.totalorder %s2220_s20, %s835_s0 }
 0x347   : > { %p2225_p8 = por %p2224_p3, %p2223_p1 }
 0x349   : > { %p2227_p11 = por %p2226_p10, %p2225_p8 }
 0x34b   : > { %p2228_p0 = pnand %p2227_p11, %p2221_p13 }
 0x34d   : > { %2231 = shalt.err (!%p2228_p0)  }
 0x34e   : > { %s2232_s13 = scalar_lea.vmem %s845_s1, 16  ;;  %p2237_p4 = scmp.lt.s32.totalorder %s845_s1, %s2567_s21 }
 0x34f   : > { %p2233_p2 = scmp.ne.s32.totalorder %s845_s1, %s2232_s13  ;;  %p2238_p5 = scmp.lt.s32.totalorder %s2570_s10, %s2232_s13 }
 0x351   : > { %p2239_p6 = por %p2238_p5, %p2237_p4 }
 0x353   : > { %p2240_p7 = pnand %p2239_p6, %p2233_p2 }
 0x355   : > { %2243 = shalt.err (!%p2240_p7)  }
 0x356   : > { %847 = dma.hbm_to_vmem [thread:$0]  %s835_s0, 16, %s845_s1, [#allocation2] }
 0x357   : > { %s867_s22 = sshll.u32 %s859_s5, 4  ;;  %s1305_s26 = sshll.u32 %s856_s16, 4  ;;  %s868_s22 = int_to_ptr.vmem [resolvable:$true] %s867_s22 }
 0x358   : > { %s858_s19 = scalar_lea.hbm %s3116_s2, %s1305_s26 }
 0x359   : > { %s2244_s27 = scalar_lea.hbm %s858_s19, 16  ;;  %p2247_p12 = scmp.lt.u32.totalorder %s858_s19, %s3116_s2 }
 0x35a   : > { %p2245_p9 = scmp.ne.s32.totalorder %s858_s19, %s2244_s27  ;;  %p2248_p13 = scmp.lt.u32.totalorder %s2559_s4, %s2244_s27 }
 0x35b   : > { %p2250_p3 = scmp.lt.u32.totalorder %s2244_s27, %s858_s19 }
 0x35c   : > { %p2249_p1 = por %p2248_p13, %p2247_p12 }
 0x35e   : > { %p2251_p8 = por %p2250_p3, %p2249_p1 }
 0x360   : > { %p2252_p10 = pnand %p2251_p8, %p2245_p9 }
 0x362   : > { %2255 = shalt.err (!%p2252_p10)  }
 0x363   : > { %s2256_s1 = scalar_lea.vmem %s868_s22, 16  ;;  %p2261_p0 = scmp.lt.s32.totalorder %s868_s22, %s2567_s21 }
 0x364   : > { %p2257_p11 = scmp.ne.s32.totalorder %s868_s22, %s2256_s1  ;;  %p2262_p2 = scmp.lt.s32.totalorder %s2570_s10, %s2256_s1 }
 0x366   : > { %p2263_p4 = por %p2262_p2, %p2261_p0 }
 0x368   : > { %p2264_p5 = pnand %p2263_p4, %p2257_p11 }
 0x36a   : > { %2267 = shalt.err (!%p2264_p5)  }
 0x36b   : > { %870 = dma.hbm_to_vmem [thread:$0]  %s858_s19, 16, %s868_s22, [#allocation2] }
 0x36c   : > { %2334 = dma.done.wait [#allocation2], 512 }
 0x36d   : > { %2335 = vsyncadd [#allocation2], 4294966784 }
 0x36e PF: > { %p1306_p6 = scmp.ge.s32.totalorder %s2532_s15, 20 }
 0x36f   : > { %v884_v0 = vlaneseq (!%p1306_p6)  ;;  %v889_v1 = vstv (!%p1306_p6), %s2532_s15  ;;  %s879_s4 = scalar_lea.vmem (!%p1306_p6), [#allocation5], %s2532_s15  ;;  %v898_v5 = vld [vmem:[%s2535_s17] sm:$0xff] (!%p1306_p6)  ;;  %v899_v10 = vld [vmem:[%s2535_s17 + $0x8] sm:$0xff] (!%p1306_p6)  ;;  %v900_v11 = vld [vmem:[%s2535_s17 + $0x10] sm:$0xff] (!%p1306_p6) }
 0x370   : > { %878 = sbr.rel (%p1306_p6) target bundleno = 891 (0x37b), region = 164  ;;  %v880_v3 = vld [vmem:[%s879_s4] sm:$0xff] (!%p1306_p6)  ;;  %v881_v9 = vld [vmem:[%s879_s4 + $0x8] sm:$0xff] (!%p1306_p6)  ;;  %v882_v13 = vld [vmem:[%s879_s4 + $0x10] sm:$0xff] (!%p1306_p6) }
 0x371   : > { %v885_v2 = vshrl.u32 (!%p1306_p6), %v884_v0, 7  ;;  %v883_v15 = vld [vmem:[%s879_s4 + $0x18] sm:$0xff] (!%p1306_p6)  ;;  %v901_v17 = vld [vmem:[%s2535_s17 + $0x18] sm:$0xff] (!%p1306_p6) }
 0x373   : > { %v890_v4 = vadd.s32 (!%p1306_p6), %v889_v1, %v885_v2  ;;  %v886_v6 = vadd.s32 (!%p1306_p6), 8, %v885_v2  ;;  %v887_v7 = vadd.s32 (!%p1306_p6), 16, %v885_v2  ;;  %v888_v8 = vadd.s32 (!%p1306_p6), 24, %v885_v2 }
 0x375   : > { %vm894_vm0 = vcmp.lt.s32.totalorder (!%p1306_p6), %v890_v4, 20  ;;  %v891_v12 = vadd.s32 (!%p1306_p6), %v889_v1, %v886_v6  ;;  %v892_v14 = vadd.s32 (!%p1306_p6), %v889_v1, %v887_v7  ;;  %v893_v16 = vadd.s32 (!%p1306_p6), %v889_v1, %v888_v8 }
 0x376   : > { %v910_v18 = vsel (!%p1306_p6), %vm894_vm0, %v880_v3, %v898_v5 }
 0x377   : > { %914 = vst [vmem:[%s2535_s17] sm:$0xff] %v910_v18  ;;  %vm895_vm1 = vcmp.lt.s32.totalorder %v891_v12, 20  ;;  %vm896_vm2 = vcmp.lt.s32.totalorder %v892_v14, 20  ;;  %vm897_vm3 = vcmp.lt.s32.totalorder %v893_v16, 20 }
 0x378   : > { %v911_v19 = vsel %vm895_vm1, %v881_v9, %v899_v10  ;;  %v912_v20 = vsel %vm896_vm2, %v882_v13, %v900_v11  ;;  %v913_v21 = vsel %vm897_vm3, %v883_v15, %v901_v17 }
 0x379   : > { %915 = vst [vmem:[%s2535_s17 + $0x8] sm:$0xff] %v911_v19  ;;  %916 = vst [vmem:[%s2535_s17 + $0x10] sm:$0xff] %v912_v20 }
 0x37a   : > { %917 = vst [vmem:[%s2535_s17 + $0x18] sm:$0xff] %v913_v21 }
 0x37b PF: > { %p3138_p7 = scmp.ne.s32.totalorder %s3129_s6, 0 }
 0x37c   : > { %s1308_s15 = sshll.u32 (%p3138_p7), %s2346_s24, 2  ;;  %s1327_s21 = smul.u32 (%p3138_p7), 9, %s2350_s25 }
 0x37d   : > { %924 = sbr.rel (!%p3138_p7) target bundleno = 949 (0x3b5), region = 168  ;;  %s926_s10 = ssub.s32 (%p3138_p7), 9, %s1308_s15 }
 0x37e   : > { %p927_p9 = scmp.lt.s32.totalorder (%p3138_p7), %s926_s10, 4  ;;  %s932_s5 = sadd.s32 (%p3138_p7), %s1327_s21, %s1308_s15 }
 0x37f   : > { %s1311_s11 = sshll.u32 (%p3138_p7), %s932_s5, 3 }
 0x380   : > { %s3056_s16 = scalar_lea.vmem (%p3138_p7), %s3117_s3, %s1311_s11  }
 0x384   : > { %s3155_s10 = smov (!%p927_p9, %s926_s10), 4 }
 0x385   : > { %s1309_s20 = sshll.u32 %s3155_s10, 7 }
 0x386   : > { %p1312_p12 = scmp.eq.s32.totalorder %s1309_s20, 0 }
 0x387   : > { %s3060_s6 = sshrl.u32 (!%p1312_p12), %s3155_s10, 2 }
 0x388   : > { %937 = sbr.rel (%p1312_p12) target bundleno = 949 (0x3b5), region = 172  ;;  %p1313_p13 = scmp.le.s32.totalorder (!%p1312_p12), %s3060_s6, 0 }
 0x38f   : > { %1175 = sbr.rel (%p1313_p13) target bundleno = 928 (0x3a0), region = 310  ;;  %s3139_s24 = smov (!%p1313_p13), %s3056_s16 }
 0x390   : > { %s3140_s25 = smov (!%p1313_p13), %s2535_s17  ;;  %s3069_s30 = smov (!%p1313_p13), 0  }
 0x391   : > { %s2376_s29 = smov (!%p1313_p13), 0  }
 0x396 LB: >> { %v1005_v22 = vld [vmem:[%s2370_s25] sm:$0xff]  ;;  %v1007_v23 = vld [vmem:[%s2370_s25 + $0x8] sm:$0xff]  ;;  %v1009_v24 = vld [vmem:[%s2370_s25 + $0x10] sm:$0xff]  ;;  %s1013_s13 = sadd.s32 1, %s2374_s30  ;;  %s999_s29 = sadd.s32 1, %s2378_s29   ;;  %s2378_s29 = sphi %s2376_s29, %s999_s29   ;;  %s2374_s30 = sphi %s3069_s30, %s3141_s30   ;;  %s2370_s25 = sphi %s3140_s25, %s1018_s25   ;;  %s2366_s24 = sphi %s3139_s24, %s1019_s24  }
 0x397   : >> { %1006 = vst [vmem:[%s2366_s24] sm:$0xff] %v1005_v22  ;;  %1008 = vst [vmem:[%s2366_s24 + $0x8] sm:$0xff] %v1007_v23  ;;  %v1011_v25 = vld [vmem:[%s2370_s25 + $0x18] sm:$0xff]  ;;  %p1014_p1 = scmp.ge.s32.totalorder %s1013_s13, %s3060_s6  ;;  %p998_p3 = scmp.ge.s32.totalorder %s999_s29, %s3060_s6 }
 0x398   : >> { %1010 = vst [vmem:[%s2366_s24 + $0x10] sm:$0xff] %v1009_v24  ;;  %1012 = vst [vmem:[%s2366_s24 + $0x18] sm:$0xff] %v1011_v25 }
 0x399   : >> { %s3157_s13 = smov (%p1014_p1, %s1013_s13), 0  ;;  %1001 = sbr.rel (!%p998_p3) target bundleno = 918 (0x396), region = 316 }
 0x39a   : >> { %s1314_s22 = sshll.u32 %s3157_s13, 5  ;;  %s3141_s30 = smov %s3157_s13 }
 0x39b   : >> { %s1018_s25 = scalar_lea.vmem %s2535_s17, %s1314_s22 [#allocation7]   ;;  %s1019_s24 = scalar_lea.vmem %s3056_s16, %s1314_s22  }
 0x3a0 PF: > { %s3085_s26 = sand.u32 3, %s3155_s10   ;;  %s1325_s7 = sshll.u32 %s3060_s6, 5 }
 0x3a1   : > { %s1024_s18 = scalar_lea.vmem %s2535_s17, %s1325_s7 [#allocation7]   ;;  %s1026_s19 = scalar_lea.vmem %s3056_s16, %s1325_s7  }
 0x3a2   : > { %p1319_p8 = scmp.le.s32.totalorder %s3085_s26, 0 }
 0x3a3   : > { %s2380_s27 = smov (!%p1319_p8), %s1026_s19   ;;  %s2384_s8 = smov (!%p1319_p8), %s1024_s18  }
 0x3a4   : > { %1189 = sbr.rel (%p1319_p8) target bundleno = 949 (0x3b5), region = 321  ;;  %s2388_s12 = smov (!%p1319_p8), 0  }
 0x3a5   : > { %s2392_s1 = smov (!%p1319_p8), 0  }
 0x3ab LB: >> { %v1036_v26 = vld [vmem:[%s2386_s8] sm:$0xff]  ;;  %s1038_s4 = sadd.s32 1, %s2390_s12  ;;  %s1030_s1 = sadd.s32 1, %s2394_s1   ;;  %s2394_s1 = sphi %s2392_s1, %s1030_s1   ;;  %s2390_s12 = sphi %s2388_s12, %s2389_s12   ;;  %s2386_s8 = sphi %s2384_s8, %s1043_s8   ;;  %s2382_s27 = sphi %s2380_s27, %s1044_s27  }
 0x3ac   : >> { %1037 = vst [vmem:[%s2382_s27] sm:$0xff] %v1036_v26  ;;  %p1039_p10 = scmp.ge.s32.totalorder %s1038_s4, %s3085_s26  ;;  %p1029_p11 = scmp.ge.s32.totalorder %s1030_s1, %s3085_s26 }
 0x3ae   : >> { %s3159_s4 = smov (%p1039_p10, %s1038_s4), 0  ;;  %1032 = sbr.rel (!%p1029_p11) target bundleno = 939 (0x3ab), region = 327 }
 0x3af   : >> { %s1320_s17 = sshll.u32 %s3159_s4, 3  ;;  %s2389_s12 = smov %s3159_s4  }
 0x3b0   : >> { %s1043_s8 = scalar_lea.vmem %s1024_s18, %s1320_s17 [#allocation7]   ;;  %s1044_s27 = scalar_lea.vmem %s1026_s19, %s1320_s17  }
 0x3b5 PF: > { %s18_s28 = sadd.s32 1, %s2362_s28   ;;  %s3142_s24 = sld [smem:[#allocation77_spill]] }
 0x3b6   : > { %p15_p0 = scmp.ge.s32.totalorder %s18_s28, 8   ;;  %s3143_s25 = sld [smem:[#allocation78_spill]] }
 0x3b7   : > { %s3144_s26 = sld [smem:[#allocation79_spill]]  ;;  %s3145_s27 = sld [smem:[#allocation80_spill]] }
 0x3b8   : > { %s3146_s22 = smov %s2342_s23  ;;  %s3147_s23 = smov %s2506_s14 }
 0x3b9   :  { %17 = sbr.rel (!%p15_p0) target bundleno = 16 (0x10), region = 338 }
 0x3c0   :  { %1060 = vsyncpa [#allocation6], 1 }
 0x3c1   :  { %1062 = vsyncpa [#allocation6 + $0x1], 1 }
 0x3c2   :  { %1063 = vsyncmov [#allocation2] }
 0x3c5   :  { %s1064_s15 = vpop.sfrf %1063 }
 0x3c6   :  { %p1324_p2 = scmp.ne.s32.totalorder %s1064_s15, 0 }
 0x3c8   :  { %1068 = shalt.err (%p1324_p2)  }

</bundles_post_ra>
